<compile_context>
chip_gen: v5e
topology: v5e:2x2
jax: 0.10.0
libtpu: 0.0.40
codegen_flags: <defaults>
</compile_context>

<pallas_src>
import jax
import jax.numpy as jnp
from jax import lax
from jax.experimental import pallas as pl
from jax.experimental.pallas import tpu as pltpu

# --- scaled-down hyperparameters (module uses 1024/1024/4; 4 layers kept) ---
EMBEDDING_DIM = 32
RNN_HIDDEN_SIZE = 32
RNN_LAYERS = 4
IN_DICT_SIZE = 50
SEQ_LEN = 10          # deliberately NOT a multiple of T_CHUNK -> exercises masked tail
BATCH = 4

T_CHUNK = 4                 # timesteps per grid step; sweep 8-16 at production sizes
INPUT_PROJ_ROW_TILE = 256   # MXU-friendly row tile (2x256 on v6e/v7x; use 128 on v5e)
_SINGLE_BUFFER_WEIGHTS = True   # request pl.Buffered(1) on resident weight blocks


def _round_up(x, m):
    return ((x + m - 1) // m) * m


def _compute_vmem_limit_bytes():
    """Generation-aware scoped-VMEM cap: ~75% of physical VMEM
    (~96-100 MiB on 128-MiB v5e/v6e, 48 MiB on v7x's 64 MiB).  Conservative
    fallback that fits every generation if the query fails."""
    try:
        cap = int(pltpu.get_tpu_info().vmem_capacity_bytes)
        return int(min(cap * 3 // 4, 100 * 1024 * 1024))
    except Exception:
        return 48 * 1024 * 1024


VMEM_LIMIT_BYTES = _compute_vmem_limit_bytes()


def _weight_spec(block_shape, index_map):
    """BlockSpec for weights with a constant index_map (resident across the
    grid): request single buffering so the resident block is not pointlessly
    double-buffered.  Falls back to the default if unavailable."""
    if _SINGLE_BUFFER_WEIGHTS:
        try:
            return pl.BlockSpec(block_shape, index_map,
                                pipeline_mode=pl.Buffered(1))
        except TypeError:           # older JAX without pipeline_mode
            pass
    return pl.BlockSpec(block_shape, index_map)


def _sigmoid_via_tanh(x):
    # sigmoid(x) = 0.5*tanh(0.5*x) + 0.5 : one EUP tanh push instead of
    # exp + reciprocal on the serial recurrence critical path.
    return 0.5 * jnp.tanh(0.5 * x) + 0.5


# --------------------------------------------------------------------------
# Kernel 1: tiled input projection  gates_pre = x @ W_ih + b
# --------------------------------------------------------------------------
def input_proj_kernel(x_ref, wih_ref, b_ref, gp_ref):
    gp_ref[...] = (
        jnp.dot(x_ref[...], wih_ref[...], preferred_element_type=jnp.float32)
        + b_ref[...])


def input_proj_pallas(x_flat, w_ih, b):
    """x_flat: (M, Din) bf16, w_ih: (Din, 4H) bf16, b: (1, 4H) f32
       -> gates_pre: (M, 4H) f32."""
    M, Din = x_flat.shape
    G = w_ih.shape[1]
    # Row tile over M = T*B (streamed, "parallel" -> megacore sharding on v7x).
    # 256 at production; 16 at tiny test shapes so the M grid is still exercised.
    tm = INPUT_PROJ_ROW_TILE if M >= INPUT_PROJ_ROW_TILE else 16
    m_pad = _round_up(M, tm)
    if m_pad != M:
        x_flat = jnp.pad(x_flat, ((0, m_pad - M), (0, 0)))
    gp = pl.pallas_call(
        input_proj_kernel,
        out_shape=jax.ShapeDtypeStruct((m_pad, G), jnp.float32),
        grid_spec=pltpu.PrefetchScalarGridSpec(
            num_scalar_prefetch=0,
            grid=(m_pad // tm,),
            in_specs=[
                pl.BlockSpec((tm, Din), lambda m: (m, 0)),   # x rows (streamed)
                _weight_spec((Din, G), lambda m: (0, 0)),    # W_ih (resident, 1-buf)
                pl.BlockSpec((1, G), lambda m: (0, 0)),      # bias (resident)
            ],
            out_specs=pl.BlockSpec((tm, G), lambda m: (m, 0)),
        ),
        compiler_params=pltpu.CompilerParams(
            dimension_semantics=("parallel",),
            vmem_limit_bytes=VMEM_LIMIT_BYTES),
    )(x_flat, w_ih, b)
    return gp[:M]


# --------------------------------------------------------------------------
# Kernel 2: LSTM recurrence over time chunks (sequential grid axis).
# --------------------------------------------------------------------------
def make_lstm_rec_kernel(t_total, t_chunk):
    def lstm_rec_kernel(gp_ref, whh_ref, y_ref, cN_ref, h_scr, c_scr):
        ci = pl.program_id(0)

        @pl.when(ci == 0)
        def _():
            # init_hidden_cell(): zeros for h0 / c0
            h_scr[...] = jnp.zeros_like(h_scr)
            c_scr[...] = jnp.zeros_like(c_scr)

        H = h_scr.shape[-1]
        base_t = ci * t_chunk

        def step(t, carry):
            h = h_scr[...]                       # (B, H) f32
            c = c_scr[...]                       # (B, H) f32
            # Recurrent matmul only; input projection + bias already in gp_ref.
            gates = gp_ref[t] + jnp.dot(
                h.astype(whh_ref.dtype), whh_ref[...],
                preferred_element_type=jnp.float32)          # (B, 4H) f32
            # NOTE: at production H=1024 these slices are 128-lane aligned.
            i = _sigmoid_via_tanh(gates[:, 0 * H:1 * H])
            f = _sigmoid_via_tanh(gates[:, 1 * H:2 * H])
            g = jnp.tanh(gates[:, 2 * H:3 * H])
            o = _sigmoid_via_tanh(gates[:, 3 * H:4 * H])
            c_new = f * c + i * g
            h_new = o * jnp.tanh(c_new)
            # Masked tail: padded timesteps (base_t + t >= T) leave h/c unchanged.
            valid = (base_t + t) < t_total
            h_new = jnp.where(valid, h_new, h)
            c_new = jnp.where(valid, c_new, c)
            h_scr[...] = h_new
            c_scr[...] = c_new
            y_ref[t] = h_new.astype(y_ref.dtype)
            return carry

        # Partial unroll keeps code size / vreg pressure bounded once Tc grows.
        lax.fori_loop(0, t_chunk, step, 0, unroll=min(t_chunk, 4))

        # c_N: constant-index output block; written unconditionally every chunk
        # (flushed to HBM once at grid end).
        cN_ref[...] = c_scr[...]

    return lstm_rec_kernel


def lstm_layer_pallas(gates_pre, w_hh, *, out_dtype=jnp.float32):
    """gates_pre: (T, B, 4H) f32, w_hh: (H, 4H) bf16
       -> (y:(T,B,H) out_dtype, c_N:(B,H) f32).  h_N == y[T-1]."""
    T, B, G = gates_pre.shape
    H = w_hh.shape[0]
    Tc = min(T_CHUNK, T)
    n_chunks = pl.cdiv(T, Tc)
    t_pad = n_chunks * Tc
    if t_pad != T:
        gates_pre = jnp.pad(gates_pre, ((0, t_pad - T), (0, 0), (0, 0)))
    y, cN = pl.pallas_call(
        make_lstm_rec_kernel(T, Tc),
        out_shape=(jax.ShapeDtypeStruct((t_pad, B, H), out_dtype),
                   jax.ShapeDtypeStruct((B, H), jnp.float32)),
        grid_spec=pltpu.PrefetchScalarGridSpec(
            num_scalar_prefetch=0,
            grid=(n_chunks,),
            in_specs=[
                # streamed activation chunk (double-buffered by default)
                pl.BlockSpec((Tc, B, G), lambda c: (c, 0, 0)),
                # W_hh: constant index_map -> resident, single-buffered
                _weight_spec((H, G), lambda c: (0, 0)),
            ],
            out_specs=[
                pl.BlockSpec((Tc, B, H), lambda c: (c, 0, 0)),  # y chunk
                pl.BlockSpec((B, H), lambda c: (0, 0)),         # c_N
            ],
            scratch_shapes=[pltpu.VMEM((B, H), jnp.float32),
                            pltpu.VMEM((B, H), jnp.float32)],
        ),
        compiler_params=pltpu.CompilerParams(
            dimension_semantics=("arbitrary",),
            vmem_limit_bytes=VMEM_LIMIT_BYTES),
    )(gates_pre, w_hh)
    return y[:T], cN


# --------------------------------------------------------------------------
# Parameters + forward
# --------------------------------------------------------------------------
def init_params(key):
    """PyTorch-style init; weights stored transposed and in bf16."""
    params = {}
    key, ek = jax.random.split(key)
    params["embedding"] = jax.random.normal(
        ek, (IN_DICT_SIZE, EMBEDDING_DIM), jnp.float32)  # nn.Embedding ~ N(0,1)

    k = 1.0 / jnp.sqrt(RNN_HIDDEN_SIZE)
    for l in range(RNN_LAYERS):
        d_in = EMBEDDING_DIM if l == 0 else RNN_HIDDEN_SIZE
        key, k1, k2, k3, k4 = jax.random.split(key, 5)
        # PyTorch: weight_ih_l{l}: (4H, d_in); stored here as (d_in, 4H) bf16.
        params[f"w_ih_{l}"] = jax.random.uniform(
            k1, (d_in, 4 * RNN_HIDDEN_SIZE), jnp.float32, -k, k
        ).astype(jnp.bfloat16)
        params[f"w_hh_{l}"] = jax.random.uniform(
            k2, (RNN_HIDDEN_SIZE, 4 * RNN_HIDDEN_SIZE), jnp.float32, -k, k
        ).astype(jnp.bfloat16)
        b_ih = jax.random.uniform(k3, (4 * RNN_HIDDEN_SIZE,), jnp.float32, -k, k)
        b_hh = jax.random.uniform(k4, (4 * RNN_HIDDEN_SIZE,), jnp.float32, -k, k)
        params[f"b_{l}"] = (b_ih + b_hh).reshape(1, 4 * RNN_HIDDEN_SIZE)
    return params


def encoder_forward(params, tokens):
    """tokens: (T, B) int32 -> (y:(T,B,H) f32, hidden:(L,B,H) f32, cell:(L,B,H) f32)."""
    T, B = tokens.shape
    # Embedding lookup (gather) kept as plain-JAX glue; single cast to bf16.
    # TODO(synk): fuse as scalar-prefetch row gather into the layer-0 projection.
    x = jnp.take(params["embedding"], tokens, axis=0).astype(jnp.bfloat16)  # (T,B,E)
    hs, cs = [], []
    y = None
    for l in range(RNN_LAYERS):
        Din = x.shape[-1]
        # Hoisted input projection: one tiled MXU matmul over all T*B rows.
        gp = input_proj_pallas(x.reshape(T * B, Din),
                               params[f"w_ih_{l}"], params[f"b_{l}"])
        gp = gp.reshape(T, B, 4 * RNN_HIDDEN_SIZE)
        # Intermediate layers emit bf16 y (next layer's projection consumes
        # bf16 anyway); final layer emits f32.
        out_dtype = jnp.float32 if l == RNN_LAYERS - 1 else jnp.bfloat16
        y, cN = lstm_layer_pallas(gp, params[f"w_hh_{l}"], out_dtype=out_dtype)
        hs.append(y[-1].astype(jnp.float32))   # h_N == y[T-1]
        cs.append(cN)
        x = y
    return y, jnp.stack(hs), jnp.stack(cs)


# ----------------------------- pure-JAX reference ---------------------------
def lstm_layer_ref(x_seq, w_ih, w_hh, b, out_dtype):
    """Mirrors the kernel's precision contract exactly (bf16 dot inputs,
    f32 accumulation, f32 gates/h/c, bf16 intermediate y)."""
    T, B, Din = x_seq.shape
    H = w_hh.shape[0]
    gp = (jnp.dot(x_seq.reshape(T * B, Din).astype(jnp.bfloat16), w_ih,
                  preferred_element_type=jnp.float32)
          + b).reshape(T, B, 4 * H)

    def step(carry, g_t):
        h, c = carry
        gates = g_t + jnp.dot(h.astype(jnp.bfloat16), w_hh,
                              preferred_element_type=jnp.float32)
        i = _sigmoid_via_tanh(gates[:, :H])
        f = _sigmoid_via_tanh(gates[:, H:2 * H])
        g = jnp.tanh(gates[:, 2 * H:3 * H])
        o = _sigmoid_via_tanh(gates[:, 3 * H:4 * H])
        c = f * c + i * g
        h = o * jnp.tanh(c)
        return (h, c), h

    (_, cN), ys = lax.scan(
        step,
        (jnp.zeros((B, H), jnp.float32), jnp.zeros((B, H), jnp.float32)),
        gp)
    ys = ys.astype(out_dtype)
    return ys, ys[-1].astype(jnp.float32), cN


def encoder_forward_ref(params, tokens):
    x = jnp.take(params["embedding"], tokens, axis=0)
    hs, cs = [], []
    y = None
    for l in range(RNN_LAYERS):
        out_dtype = jnp.float32 if l == RNN_LAYERS - 1 else jnp.bfloat16
        y, hN, cN = lstm_layer_ref(x, params[f"w_ih_{l}"], params[f"w_hh_{l}"],
                                   params[f"b_{l}"], out_dtype)
        hs.append(hN)
        cs.append(cN)
        x = y
    return y, jnp.stack(hs), jnp.stack(cs)


if __name__ == "__main__":
    key = jax.random.PRNGKey(0)
    pkey, tkey = jax.random.split(key)
    params = init_params(pkey)
    tokens = jax.random.randint(tkey, (SEQ_LEN, BATCH), 0, IN_DICT_SIZE,
                                dtype=jnp.int32)

    encoder_forward_jit = jax.jit(encoder_forward)
    try:
        y, hidden, cell = jax.block_until_ready(encoder_forward_jit(params, tokens))
    except Exception:
        # Some JAX/Mosaic builds reject pipeline_mode=Buffered(1) on the
        # top-level pallas_call path; retry with default double-buffered weights.
        _SINGLE_BUFFER_WEIGHTS = False
        encoder_forward_jit = jax.jit(encoder_forward)
        y, hidden, cell = jax.block_until_ready(encoder_forward_jit(params, tokens))

    y_ref, h_ref, c_ref = encoder_forward_ref(params, tokens)

    assert y.shape == (SEQ_LEN, BATCH, RNN_HIDDEN_SIZE)
    assert hidden.shape == (RNN_LAYERS, BATCH, RNN_HIDDEN_SIZE)
    assert cell.shape == (RNN_LAYERS, BATCH, RNN_HIDDEN_SIZE)
    # bf16 weights + bf16 intermediate activations (accepted precision
    # contract) vs the precision-mirrored reference.
    assert jnp.allclose(y, y_ref, atol=1e-2, rtol=1e-2)
    assert jnp.allclose(hidden, h_ref, atol=1e-2, rtol=1e-2)
    assert jnp.allclose(cell, c_ref, atol=1e-2, rtol=1e-2)

    print("KERNEL_OK")
</pallas_src>

<mosaic_0001>
module attributes {stable_mosaic.version = 11 : i64} {
  func.func @input_proj_kernel(%arg0: i32, %arg1: memref<16x32xbf16, #tpu.memory_space<vmem>>, %arg2: memref<32x128xbf16, #tpu.memory_space<vmem>>, %arg3: memref<1x128xf32, #tpu.memory_space<vmem>>, %arg4: memref<16x128xf32, #tpu.memory_space<vmem>>) attributes {dimension_semantics = [#tpu.dimension_semantics<parallel>], iteration_bounds = array<i64: 3>, scalar_prefetch = 0 : i64, scratch_operands = 0 : i64, tpu.core_type = #tpu.core_type<tc>, window_params = [{transform_indices = @transform_0, window_bounds = array<i64: 16, 32>}, {pipeline_mode = #tpu.pipeline_mode<synchronous>, transform_indices = @transform_1, window_bounds = array<i64: 32, 128>}, {pipeline_mode = #tpu.pipeline_mode<synchronous>, transform_indices = @transform_2, window_bounds = array<i64: 1, 128>}, {transform_indices = @transform_3, window_bounds = array<i64: 16, 128>}]} {
    %c0 = arith.constant 0 : index
    %c0_0 = arith.constant 0 : index
    %0 = vector.load %arg1[%c0, %c0_0] : memref<16x32xbf16, #tpu.memory_space<vmem>>, vector<16x32xbf16>
    %c0_1 = arith.constant 0 : index
    %c0_2 = arith.constant 0 : index
    %1 = vector.load %arg2[%c0_1, %c0_2] : memref<32x128xbf16, #tpu.memory_space<vmem>>, vector<32x128xbf16>
    %cst = arith.constant dense<0.000000e+00> : vector<16x128xf32>
    %2 = tpu.matmul %0, %1, %cst {dimension_numbers = #tpu.dot_dimension_numbers<[1], [0], [0], [1], [0, 0, 1, 1], [], []>} : vector<16x32xbf16>, vector<32x128xbf16>, vector<16x128xf32> -> vector<16x128xf32>
    %c0_3 = arith.constant 0 : index
    %c0_4 = arith.constant 0 : index
    %3 = vector.load %arg3[%c0_3, %c0_4] : memref<1x128xf32, #tpu.memory_space<vmem>>, vector<1x128xf32>
    %4 = vector.broadcast %3 : vector<1x128xf32> to vector<16x128xf32>
    %5 = arith.addf %2, %4 : vector<16x128xf32>
    %c0_5 = arith.constant 0 : index
    %c0_6 = arith.constant 0 : index
    %6 = vector.load %arg4[%c0_5, %c0_6] : memref<16x128xf32, #tpu.memory_space<vmem>>, vector<16x128xf32>
    tpu.vector_store %arg4[%c0_5, %c0_6], %5 {strides = array<i32>} : memref<16x128xf32, #tpu.memory_space<vmem>>, vector<16x128xf32>,
    return
  }
  func.func @transform_0(%arg0: i32) -> (i32, i32) {
    %c0_i32 = arith.constant 0 : i32
    %c0_i32_0 = arith.constant 0 : i32
    return %arg0, %c0_i32 : i32, i32
  }
  func.func @transform_1(%arg0: i32) -> (i32, i32) {
    %c0_i32 = arith.constant 0 : i32
    %c0_i32_0 = arith.constant 0 : i32
    %c0_i32_1 = arith.constant 0 : i32
    return %c0_i32, %c0_i32_0 : i32, i32
  }
  func.func @transform_2(%arg0: i32) -> (i32, i32) {
    %c0_i32 = arith.constant 0 : i32
    %c0_i32_0 = arith.constant 0 : i32
    %c0_i32_1 = arith.constant 0 : i32
    return %c0_i32, %c0_i32_0 : i32, i32
  }
  func.func @transform_3(%arg0: i32) -> (i32, i32) {
    %c0_i32 = arith.constant 0 : i32
    %c0_i32_0 = arith.constant 0 : i32
    return %arg0, %c0_i32 : i32, i32
  }
}

module attributes {stable_mosaic.version = 11 : i64} {
  func.func @lstm_rec_kernel(%arg0: i32, %arg1: memref<4x4x128xf32, #tpu.memory_space<vmem>>, %arg2: memref<32x128xbf16, #tpu.memory_space<vmem>>, %arg3: memref<4x4x32xf32, #tpu.memory_space<vmem>>, %arg4: memref<4x32xf32, #tpu.memory_space<vmem>>, %arg5: memref<4x32xf32, #tpu.memory_space<vmem>>, %arg6: memref<4x32xf32, #tpu.memory_space<vmem>>) attributes {dimension_semantics = [#tpu.dimension_semantics<arbitrary>], iteration_bounds = array<i64: 3>, scalar_prefetch = 0 : i64, scratch_operands = 2 : i64, tpu.core_type = #tpu.core_type<tc>, window_params = [{transform_indices = @transform_0, window_bounds = array<i64: 4, 4, 128>}, {pipeline_mode = #tpu.pipeline_mode<synchronous>, transform_indices = @transform_1, window_bounds = array<i64: 32, 128>}, {transform_indices = @transform_2, window_bounds = array<i64: 4, 4, 32>}, {pipeline_mode = #tpu.pipeline_mode<synchronous>, transform_indices = @transform_3, window_bounds = array<i64: 4, 32>}]} {
    %c0_i32 = arith.constant 0 : i32
    %0 = arith.cmpi eq, %arg0, %c0_i32 : i32
    %1 = arith.extui %0 : i1 to i32
    %c0_i32_0 = arith.constant 0 : i32
    %2 = arith.cmpi ne, %1, %c0_i32_0 : i32
    scf.if %2 {
      %cst_104 = arith.constant 0.000000e+00 : f32
      %206 = vector.broadcast %cst_104 : f32 to vector<4x32xf32>
      %c0_105 = arith.constant 0 : index
      %c0_106 = arith.constant 0 : index
      %207 = vector.load %arg5[%c0_105, %c0_106] : memref<4x32xf32, #tpu.memory_space<vmem>>, vector<4x32xf32>
      tpu.vector_store %arg5[%c0_105, %c0_106], %206 {strides = array<i32>} : memref<4x32xf32, #tpu.memory_space<vmem>>, vector<4x32xf32>,
      %cst_107 = arith.constant 0.000000e+00 : f32
      %208 = vector.broadcast %cst_107 : f32 to vector<4x32xf32>
      %c0_108 = arith.constant 0 : index
      %c0_109 = arith.constant 0 : index
      %209 = vector.load %arg6[%c0_108, %c0_109] : memref<4x32xf32, #tpu.memory_space<vmem>>, vector<4x32xf32>
      tpu.vector_store %arg6[%c0_108, %c0_109], %208 {strides = array<i32>} : memref<4x32xf32, #tpu.memory_space<vmem>>, vector<4x32xf32>,
    } else {
    }
    %c4_i32 = arith.constant 4 : i32
    %3 = arith.muli %arg0, %c4_i32 : i32
    %c0_i32_1 = arith.constant 0 : i32
    %c0 = arith.constant 0 : index
    %c0_2 = arith.constant 0 : index
    %4 = vector.load %arg5[%c0, %c0_2] : memref<4x32xf32, #tpu.memory_space<vmem>>, vector<4x32xf32>
    %c0_3 = arith.constant 0 : index
    %c0_4 = arith.constant 0 : index
    %5 = vector.load %arg6[%c0_3, %c0_4] : memref<4x32xf32, #tpu.memory_space<vmem>>, vector<4x32xf32>
    %6 = arith.index_cast %c0_i32_1 : i32 to index
    %c0_5 = arith.constant 0 : index
    %c0_6 = arith.constant 0 : index
    %7 = vector.load %arg1[%6, %c0_5, %c0_6] : memref<4x4x128xf32, #tpu.memory_space<vmem>>, vector<1x4x128xf32>
    %8 = vector.shape_cast %7 : vector<1x4x128xf32> to vector<4x128xf32>
    %9 = arith.truncf %4 : vector<4x32xf32> to vector<4x32xbf16>
    %c0_7 = arith.constant 0 : index
    %c0_8 = arith.constant 0 : index
    %10 = vector.load %arg2[%c0_7, %c0_8] : memref<32x128xbf16, #tpu.memory_space<vmem>>, vector<32x128xbf16>
    %cst = arith.constant dense<0.000000e+00> : vector<4x128xf32>
    %11 = tpu.matmul %9, %10, %cst {dimension_numbers = #tpu.dot_dimension_numbers<[1], [0], [0], [1], [0, 0, 1, 1], [], []>} : vector<4x32xbf16>, vector<32x128xbf16>, vector<4x128xf32> -> vector<4x128xf32>
    %12 = arith.addf %8, %11 : vector<4x128xf32>
    %13 = vector.extract_strided_slice %12 {offsets = [0, 0], sizes = [4, 32], strides = [1, 1]} : vector<4x128xf32> to vector<4x32xf32>
    %cst_9 = arith.constant 5.000000e-01 : f32
    %14 = vector.broadcast %cst_9 : f32 to vector<4x32xf32>
    %15 = arith.mulf %14, %13 : vector<4x32xf32>
    %16 = math.tanh %15 : vector<4x32xf32>
    %cst_10 = arith.constant 5.000000e-01 : f32
    %17 = vector.broadcast %cst_10 : f32 to vector<4x32xf32>
    %18 = arith.mulf %17, %16 : vector<4x32xf32>
    %cst_11 = arith.constant 5.000000e-01 : f32
    %19 = vector.broadcast %cst_11 : f32 to vector<4x32xf32>
    %20 = arith.addf %18, %19 : vector<4x32xf32>
    %21 = vector.extract_strided_slice %12 {offsets = [0, 32], sizes = [4, 32], strides = [1, 1]} : vector<4x128xf32> to vector<4x32xf32>
    %cst_12 = arith.constant 5.000000e-01 : f32
    %22 = vector.broadcast %cst_12 : f32 to vector<4x32xf32>
    %23 = arith.mulf %22, %21 : vector<4x32xf32>
    %24 = math.tanh %23 : vector<4x32xf32>
    %cst_13 = arith.constant 5.000000e-01 : f32
    %25 = vector.broadcast %cst_13 : f32 to vector<4x32xf32>
    %26 = arith.mulf %25, %24 : vector<4x32xf32>
    %cst_14 = arith.constant 5.000000e-01 : f32
    %27 = vector.broadcast %cst_14 : f32 to vector<4x32xf32>
    %28 = arith.addf %26, %27 : vector<4x32xf32>
    %29 = vector.extract_strided_slice %12 {offsets = [0, 64], sizes = [4, 32], strides = [1, 1]} : vector<4x128xf32> to vector<4x32xf32>
    %30 = math.tanh %29 : vector<4x32xf32>
    %31 = vector.extract_strided_slice %12 {offsets = [0, 96], sizes = [4, 32], strides = [1, 1]} : vector<4x128xf32> to vector<4x32xf32>
    %cst_15 = arith.constant 5.000000e-01 : f32
    %32 = vector.broadcast %cst_15 : f32 to vector<4x32xf32>
    %33 = arith.mulf %32, %31 : vector<4x32xf32>
    %34 = math.tanh %33 : vector<4x32xf32>
    %cst_16 = arith.constant 5.000000e-01 : f32
    %35 = vector.broadcast %cst_16 : f32 to vector<4x32xf32>
    %36 = arith.mulf %35, %34 : vector<4x32xf32>
    %cst_17 = arith.constant 5.000000e-01 : f32
    %37 = vector.broadcast %cst_17 : f32 to vector<4x32xf32>
    %38 = arith.addf %36, %37 : vector<4x32xf32>
    %39 = arith.mulf %28, %5 : vector<4x32xf32>
    %40 = arith.mulf %20, %30 : vector<4x32xf32>
    %41 = arith.addf %39, %40 : vector<4x32xf32>
    %42 = math.tanh %41 : vector<4x32xf32>
    %43 = arith.mulf %38, %42 : vector<4x32xf32>
    %44 = arith.addi %3, %c0_i32_1 : i32
    %c10_i32 = arith.constant 10 : i32
    %45 = arith.cmpi slt, %44, %c10_i32 : i32
    %46 = arith.select %45, %43, %4 : vector<4x32xf32>
    %47 = arith.select %45, %41, %5 : vector<4x32xf32>
    %c0_18 = arith.constant 0 : index
    %c0_19 = arith.constant 0 : index
    %48 = vector.load %arg5[%c0_18, %c0_19] : memref<4x32xf32, #tpu.memory_space<vmem>>, vector<4x32xf32>
    tpu.vector_store %arg5[%c0_18, %c0_19], %46 {strides = array<i32>} : memref<4x32xf32, #tpu.memory_space<vmem>>, vector<4x32xf32>,
    %c0_20 = arith.constant 0 : index
    %c0_21 = arith.constant 0 : index
    %49 = vector.load %arg6[%c0_20, %c0_21] : memref<4x32xf32, #tpu.memory_space<vmem>>, vector<4x32xf32>
    tpu.vector_store %arg6[%c0_20, %c0_21], %47 {strides = array<i32>} : memref<4x32xf32, #tpu.memory_space<vmem>>, vector<4x32xf32>,
    %50 = arith.index_cast %c0_i32_1 : i32 to index
    %c0_22 = arith.constant 0 : index
    %c0_23 = arith.constant 0 : index
    %51 = vector.load %arg3[%50, %c0_22, %c0_23] : memref<4x4x32xf32, #tpu.memory_space<vmem>>, vector<1x4x32xf32>
    %52 = vector.shape_cast %51 : vector<1x4x32xf32> to vector<4x32xf32>
    %53 = vector.shape_cast %46 : vector<4x32xf32> to vector<1x4x32xf32>
    tpu.vector_store %arg3[%50, %c0_22, %c0_23], %53 {strides = array<i32>} : memref<4x4x32xf32, #tpu.memory_space<vmem>>, vector<1x4x32xf32>,
    %c1_i32 = arith.constant 1 : i32
    %c0_24 = arith.constant 0 : index
    %c0_25 = arith.constant 0 : index
    %54 = vector.load %arg5[%c0_24, %c0_25] : memref<4x32xf32, #tpu.memory_space<vmem>>, vector<4x32xf32>
    %c0_26 = arith.constant 0 : index
    %c0_27 = arith.constant 0 : index
    %55 = vector.load %arg6[%c0_26, %c0_27] : memref<4x32xf32, #tpu.memory_space<vmem>>, vector<4x32xf32>
    %56 = arith.index_cast %c1_i32 : i32 to index
    %c0_28 = arith.constant 0 : index
    %c0_29 = arith.constant 0 : index
    %57 = vector.load %arg1[%56, %c0_28, %c0_29] : memref<4x4x128xf32, #tpu.memory_space<vmem>>, vector<1x4x128xf32>
    %58 = vector.shape_cast %57 : vector<1x4x128xf32> to vector<4x128xf32>
    %59 = arith.truncf %54 : vector<4x32xf32> to vector<4x32xbf16>
    %c0_30 = arith.constant 0 : index
    %c0_31 = arith.constant 0 : index
    %60 = vector.load %arg2[%c0_30, %c0_31] : memref<32x128xbf16, #tpu.memory_space<vmem>>, vector<32x128xbf16>
    %cst_32 = arith.constant dense<0.000000e+00> : vector<4x128xf32>
    %61 = tpu.matmul %59, %60, %cst_32 {dimension_numbers = #tpu.dot_dimension_numbers<[1], [0], [0], [1], [0, 0, 1, 1], [], []>} : vector<4x32xbf16>, vector<32x128xbf16>, vector<4x128xf32> -> vector<4x128xf32>
    %62 = arith.addf %58, %61 : vector<4x128xf32>
    %63 = vector.extract_strided_slice %62 {offsets = [0, 0], sizes = [4, 32], strides = [1, 1]} : vector<4x128xf32> to vector<4x32xf32>
    %cst_33 = arith.constant 5.000000e-01 : f32
    %64 = vector.broadcast %cst_33 : f32 to vector<4x32xf32>
    %65 = arith.mulf %64, %63 : vector<4x32xf32>
    %66 = math.tanh %65 : vector<4x32xf32>
    %cst_34 = arith.constant 5.000000e-01 : f32
    %67 = vector.broadcast %cst_34 : f32 to vector<4x32xf32>
    %68 = arith.mulf %67, %66 : vector<4x32xf32>
    %cst_35 = arith.constant 5.000000e-01 : f32
    %69 = vector.broadcast %cst_35 : f32 to vector<4x32xf32>
    %70 = arith.addf %68, %69 : vector<4x32xf32>
    %71 = vector.extract_strided_slice %62 {offsets = [0, 32], sizes = [4, 32], strides = [1, 1]} : vector<4x128xf32> to vector<4x32xf32>
    %cst_36 = arith.constant 5.000000e-01 : f32
    %72 = vector.broadcast %cst_36 : f32 to vector<4x32xf32>
    %73 = arith.mulf %72, %71 : vector<4x32xf32>
    %74 = math.tanh %73 : vector<4x32xf32>
    %cst_37 = arith.constant 5.000000e-01 : f32
    %75 = vector.broadcast %cst_37 : f32 to vector<4x32xf32>
    %76 = arith.mulf %75, %74 : vector<4x32xf32>
    %cst_38 = arith.constant 5.000000e-01 : f32
    %77 = vector.broadcast %cst_38 : f32 to vector<4x32xf32>
    %78 = arith.addf %76, %77 : vector<4x32xf32>
    %79 = vector.extract_strided_slice %62 {offsets = [0, 64], sizes = [4, 32], strides = [1, 1]} : vector<4x128xf32> to vector<4x32xf32>
    %80 = math.tanh %79 : vector<4x32xf32>
    %81 = vector.extract_strided_slice %62 {offsets = [0, 96], sizes = [4, 32], strides = [1, 1]} : vector<4x128xf32> to vector<4x32xf32>
    %cst_39 = arith.constant 5.000000e-01 : f32
    %82 = vector.broadcast %cst_39 : f32 to vector<4x32xf32>
    %83 = arith.mulf %82, %81 : vector<4x32xf32>
    %84 = math.tanh %83 : vector<4x32xf32>
    %cst_40 = arith.constant 5.000000e-01 : f32
    %85 = vector.broadcast %cst_40 : f32 to vector<4x32xf32>
    %86 = arith.mulf %85, %84 : vector<4x32xf32>
    %cst_41 = arith.constant 5.000000e-01 : f32
    %87 = vector.broadcast %cst_41 : f32 to vector<4x32xf32>
    %88 = arith.addf %86, %87 : vector<4x32xf32>
    %89 = arith.mulf %78, %55 : vector<4x32xf32>
    %90 = arith.mulf %70, %80 : vector<4x32xf32>
    %91 = arith.addf %89, %90 : vector<4x32xf32>
    %92 = math.tanh %91 : vector<4x32xf32>
    %93 = arith.mulf %88, %92 : vector<4x32xf32>
    %94 = arith.addi %3, %c1_i32 : i32
    %c10_i32_42 = arith.constant 10 : i32
    %95 = arith.cmpi slt, %94, %c10_i32_42 : i32
    %96 = arith.select %95, %93, %54 : vector<4x32xf32>
    %97 = arith.select %95, %91, %55 : vector<4x32xf32>
    %c0_43 = arith.constant 0 : index
    %c0_44 = arith.constant 0 : index
    %98 = vector.load %arg5[%c0_43, %c0_44] : memref<4x32xf32, #tpu.memory_space<vmem>>, vector<4x32xf32>
    tpu.vector_store %arg5[%c0_43, %c0_44], %96 {strides = array<i32>} : memref<4x32xf32, #tpu.memory_space<vmem>>, vector<4x32xf32>,
    %c0_45 = arith.constant 0 : index
    %c0_46 = arith.constant 0 : index
    %99 = vector.load %arg6[%c0_45, %c0_46] : memref<4x32xf32, #tpu.memory_space<vmem>>, vector<4x32xf32>
    tpu.vector_store %arg6[%c0_45, %c0_46], %97 {strides = array<i32>} : memref<4x32xf32, #tpu.memory_space<vmem>>, vector<4x32xf32>,
    %100 = arith.index_cast %c1_i32 : i32 to index
    %c0_47 = arith.constant 0 : index
    %c0_48 = arith.constant 0 : index
    %101 = vector.load %arg3[%100, %c0_47, %c0_48] : memref<4x4x32xf32, #tpu.memory_space<vmem>>, vector<1x4x32xf32>
    %102 = vector.shape_cast %101 : vector<1x4x32xf32> to vector<4x32xf32>
    %103 = vector.shape_cast %96 : vector<4x32xf32> to vector<1x4x32xf32>
    tpu.vector_store %arg3[%100, %c0_47, %c0_48], %103 {strides = array<i32>} : memref<4x4x32xf32, #tpu.memory_space<vmem>>, vector<1x4x32xf32>,
    %c2_i32 = arith.constant 2 : i32
    %c0_49 = arith.constant 0 : index
    %c0_50 = arith.constant 0 : index
    %104 = vector.load %arg5[%c0_49, %c0_50] : memref<4x32xf32, #tpu.memory_space<vmem>>, vector<4x32xf32>
    %c0_51 = arith.constant 0 : index
    %c0_52 = arith.constant 0 : index
    %105 = vector.load %arg6[%c0_51, %c0_52] : memref<4x32xf32, #tpu.memory_space<vmem>>, vector<4x32xf32>
    %106 = arith.index_cast %c2_i32 : i32 to index
    %c0_53 = arith.constant 0 : index
    %c0_54 = arith.constant 0 : index
    %107 = vector.load %arg1[%106, %c0_53, %c0_54] : memref<4x4x128xf32, #tpu.memory_space<vmem>>, vector<1x4x128xf32>
    %108 = vector.shape_cast %107 : vector<1x4x128xf32> to vector<4x128xf32>
    %109 = arith.truncf %104 : vector<4x32xf32> to vector<4x32xbf16>
    %c0_55 = arith.constant 0 : index
    %c0_56 = arith.constant 0 : index
    %110 = vector.load %arg2[%c0_55, %c0_56] : memref<32x128xbf16, #tpu.memory_space<vmem>>, vector<32x128xbf16>
    %cst_57 = arith.constant dense<0.000000e+00> : vector<4x128xf32>
    %111 = tpu.matmul %109, %110, %cst_57 {dimension_numbers = #tpu.dot_dimension_numbers<[1], [0], [0], [1], [0, 0, 1, 1], [], []>} : vector<4x32xbf16>, vector<32x128xbf16>, vector<4x128xf32> -> vector<4x128xf32>
    %112 = arith.addf %108, %111 : vector<4x128xf32>
    %113 = vector.extract_strided_slice %112 {offsets = [0, 0], sizes = [4, 32], strides = [1, 1]} : vector<4x128xf32> to vector<4x32xf32>
    %cst_58 = arith.constant 5.000000e-01 : f32
    %114 = vector.broadcast %cst_58 : f32 to vector<4x32xf32>
    %115 = arith.mulf %114, %113 : vector<4x32xf32>
    %116 = math.tanh %115 : vector<4x32xf32>
    %cst_59 = arith.constant 5.000000e-01 : f32
    %117 = vector.broadcast %cst_59 : f32 to vector<4x32xf32>
    %118 = arith.mulf %117, %116 : vector<4x32xf32>
    %cst_60 = arith.constant 5.000000e-01 : f32
    %119 = vector.broadcast %cst_60 : f32 to vector<4x32xf32>
    %120 = arith.addf %118, %119 : vector<4x32xf32>
    %121 = vector.extract_strided_slice %112 {offsets = [0, 32], sizes = [4, 32], strides = [1, 1]} : vector<4x128xf32> to vector<4x32xf32>
    %cst_61 = arith.constant 5.000000e-01 : f32
    %122 = vector.broadcast %cst_61 : f32 to vector<4x32xf32>
    %123 = arith.mulf %122, %121 : vector<4x32xf32>
    %124 = math.tanh %123 : vector<4x32xf32>
    %cst_62 = arith.constant 5.000000e-01 : f32
    %125 = vector.broadcast %cst_62 : f32 to vector<4x32xf32>
    %126 = arith.mulf %125, %124 : vector<4x32xf32>
    %cst_63 = arith.constant 5.000000e-01 : f32
    %127 = vector.broadcast %cst_63 : f32 to vector<4x32xf32>
    %128 = arith.addf %126, %127 : vector<4x32xf32>
    %129 = vector.extract_strided_slice %112 {offsets = [0, 64], sizes = [4, 32], strides = [1, 1]} : vector<4x128xf32> to vector<4x32xf32>
    %130 = math.tanh %129 : vector<4x32xf32>
    %131 = vector.extract_strided_slice %112 {offsets = [0, 96], sizes = [4, 32], strides = [1, 1]} : vector<4x128xf32> to vector<4x32xf32>
    %cst_64 = arith.constant 5.000000e-01 : f32
    %132 = vector.broadcast %cst_64 : f32 to vector<4x32xf32>
    %133 = arith.mulf %132, %131 : vector<4x32xf32>
    %134 = math.tanh %133 : vector<4x32xf32>
    %cst_65 = arith.constant 5.000000e-01 : f32
    %135 = vector.broadcast %cst_65 : f32 to vector<4x32xf32>
    %136 = arith.mulf %135, %134 : vector<4x32xf32>
    %cst_66 = arith.constant 5.000000e-01 : f32
    %137 = vector.broadcast %cst_66 : f32 to vector<4x32xf32>
    %138 = arith.addf %136, %137 : vector<4x32xf32>
    %139 = arith.mulf %128, %105 : vector<4x32xf32>
    %140 = arith.mulf %120, %130 : vector<4x32xf32>
    %141 = arith.addf %139, %140 : vector<4x32xf32>
    %142 = math.tanh %141 : vector<4x32xf32>
    %143 = arith.mulf %138, %142 : vector<4x32xf32>
    %144 = arith.addi %3, %c2_i32 : i32
    %c10_i32_67 = arith.constant 10 : i32
    %145 = arith.cmpi slt, %144, %c10_i32_67 : i32
    %146 = arith.select %145, %143, %104 : vector<4x32xf32>
    %147 = arith.select %145, %141, %105 : vector<4x32xf32>
    %c0_68 = arith.constant 0 : index
    %c0_69 = arith.constant 0 : index
    %148 = vector.load %arg5[%c0_68, %c0_69] : memref<4x32xf32, #tpu.memory_space<vmem>>, vector<4x32xf32>
    tpu.vector_store %arg5[%c0_68, %c0_69], %146 {strides = array<i32>} : memref<4x32xf32, #tpu.memory_space<vmem>>, vector<4x32xf32>,
    %c0_70 = arith.constant 0 : index
    %c0_71 = arith.constant 0 : index
    %149 = vector.load %arg6[%c0_70, %c0_71] : memref<4x32xf32, #tpu.memory_space<vmem>>, vector<4x32xf32>
    tpu.vector_store %arg6[%c0_70, %c0_71], %147 {strides = array<i32>} : memref<4x32xf32, #tpu.memory_space<vmem>>, vector<4x32xf32>,
    %150 = arith.index_cast %c2_i32 : i32 to index
    %c0_72 = arith.constant 0 : index
    %c0_73 = arith.constant 0 : index
    %151 = vector.load %arg3[%150, %c0_72, %c0_73] : memref<4x4x32xf32, #tpu.memory_space<vmem>>, vector<1x4x32xf32>
    %152 = vector.shape_cast %151 : vector<1x4x32xf32> to vector<4x32xf32>
    %153 = vector.shape_cast %146 : vector<4x32xf32> to vector<1x4x32xf32>
    tpu.vector_store %arg3[%150, %c0_72, %c0_73], %153 {strides = array<i32>} : memref<4x4x32xf32, #tpu.memory_space<vmem>>, vector<1x4x32xf32>,
    %c3_i32 = arith.constant 3 : i32
    %c0_74 = arith.constant 0 : index
    %c0_75 = arith.constant 0 : index
    %154 = vector.load %arg5[%c0_74, %c0_75] : memref<4x32xf32, #tpu.memory_space<vmem>>, vector<4x32xf32>
    %c0_76 = arith.constant 0 : index
    %c0_77 = arith.constant 0 : index
    %155 = vector.load %arg6[%c0_76, %c0_77] : memref<4x32xf32, #tpu.memory_space<vmem>>, vector<4x32xf32>
    %156 = arith.index_cast %c3_i32 : i32 to index
    %c0_78 = arith.constant 0 : index
    %c0_79 = arith.constant 0 : index
    %157 = vector.load %arg1[%156, %c0_78, %c0_79] : memref<4x4x128xf32, #tpu.memory_space<vmem>>, vector<1x4x128xf32>
    %158 = vector.shape_cast %157 : vector<1x4x128xf32> to vector<4x128xf32>
    %159 = arith.truncf %154 : vector<4x32xf32> to vector<4x32xbf16>
    %c0_80 = arith.constant 0 : index
    %c0_81 = arith.constant 0 : index
    %160 = vector.load %arg2[%c0_80, %c0_81] : memref<32x128xbf16, #tpu.memory_space<vmem>>, vector<32x128xbf16>
    %cst_82 = arith.constant dense<0.000000e+00> : vector<4x128xf32>
    %161 = tpu.matmul %159, %160, %cst_82 {dimension_numbers = #tpu.dot_dimension_numbers<[1], [0], [0], [1], [0, 0, 1, 1], [], []>} : vector<4x32xbf16>, vector<32x128xbf16>, vector<4x128xf32> -> vector<4x128xf32>
    %162 = arith.addf %158, %161 : vector<4x128xf32>
    %163 = vector.extract_strided_slice %162 {offsets = [0, 0], sizes = [4, 32], strides = [1, 1]} : vector<4x128xf32> to vector<4x32xf32>
    %cst_83 = arith.constant 5.000000e-01 : f32
    %164 = vector.broadcast %cst_83 : f32 to vector<4x32xf32>
    %165 = arith.mulf %164, %163 : vector<4x32xf32>
    %166 = math.tanh %165 : vector<4x32xf32>
    %cst_84 = arith.constant 5.000000e-01 : f32
    %167 = vector.broadcast %cst_84 : f32 to vector<4x32xf32>
    %168 = arith.mulf %167, %166 : vector<4x32xf32>
    %cst_85 = arith.constant 5.000000e-01 : f32
    %169 = vector.broadcast %cst_85 : f32 to vector<4x32xf32>
    %170 = arith.addf %168, %169 : vector<4x32xf32>
    %171 = vector.extract_strided_slice %162 {offsets = [0, 32], sizes = [4, 32], strides = [1, 1]} : vector<4x128xf32> to vector<4x32xf32>
    %cst_86 = arith.constant 5.000000e-01 : f32
    %172 = vector.broadcast %cst_86 : f32 to vector<4x32xf32>
    %173 = arith.mulf %172, %171 : vector<4x32xf32>
    %174 = math.tanh %173 : vector<4x32xf32>
    %cst_87 = arith.constant 5.000000e-01 : f32
    %175 = vector.broadcast %cst_87 : f32 to vector<4x32xf32>
    %176 = arith.mulf %175, %174 : vector<4x32xf32>
    %cst_88 = arith.constant 5.000000e-01 : f32
    %177 = vector.broadcast %cst_88 : f32 to vector<4x32xf32>
    %178 = arith.addf %176, %177 : vector<4x32xf32>
    %179 = vector.extract_strided_slice %162 {offsets = [0, 64], sizes = [4, 32], strides = [1, 1]} : vector<4x128xf32> to vector<4x32xf32>
    %180 = math.tanh %179 : vector<4x32xf32>
    %181 = vector.extract_strided_slice %162 {offsets = [0, 96], sizes = [4, 32], strides = [1, 1]} : vector<4x128xf32> to vector<4x32xf32>
    %cst_89 = arith.constant 5.000000e-01 : f32
    %182 = vector.broadcast %cst_89 : f32 to vector<4x32xf32>
    %183 = arith.mulf %182, %181 : vector<4x32xf32>
    %184 = math.tanh %183 : vector<4x32xf32>
    %cst_90 = arith.constant 5.000000e-01 : f32
    %185 = vector.broadcast %cst_90 : f32 to vector<4x32xf32>
    %186 = arith.mulf %185, %184 : vector<4x32xf32>
    %cst_91 = arith.constant 5.000000e-01 : f32
    %187 = vector.broadcast %cst_91 : f32 to vector<4x32xf32>
    %188 = arith.addf %186, %187 : vector<4x32xf32>
    %189 = arith.mulf %178, %155 : vector<4x32xf32>
    %190 = arith.mulf %170, %180 : vector<4x32xf32>
    %191 = arith.addf %189, %190 : vector<4x32xf32>
    %192 = math.tanh %191 : vector<4x32xf32>
    %193 = arith.mulf %188, %192 : vector<4x32xf32>
    %194 = arith.addi %3, %c3_i32 : i32
    %c10_i32_92 = arith.constant 10 : i32
    %195 = arith.cmpi slt, %194, %c10_i32_92 : i32
    %196 = arith.select %195, %193, %154 : vector<4x32xf32>
    %197 = arith.select %195, %191, %155 : vector<4x32xf32>
    %c0_93 = arith.constant 0 : index
    %c0_94 = arith.constant 0 : index
    %198 = vector.load %arg5[%c0_93, %c0_94] : memref<4x32xf32, #tpu.memory_space<vmem>>, vector<4x32xf32>
    tpu.vector_store %arg5[%c0_93, %c0_94], %196 {strides = array<i32>} : memref<4x32xf32, #tpu.memory_space<vmem>>, vector<4x32xf32>,
    %c0_95 = arith.constant 0 : index
    %c0_96 = arith.constant 0 : index
    %199 = vector.load %arg6[%c0_95, %c0_96] : memref<4x32xf32, #tpu.memory_space<vmem>>, vector<4x32xf32>
    tpu.vector_store %arg6[%c0_95, %c0_96], %197 {strides = array<i32>} : memref<4x32xf32, #tpu.memory_space<vmem>>, vector<4x32xf32>,
    %200 = arith.index_cast %c3_i32 : i32 to index
    %c0_97 = arith.constant 0 : index
    %c0_98 = arith.constant 0 : index
    %201 = vector.load %arg3[%200, %c0_97, %c0_98] : memref<4x4x32xf32, #tpu.memory_space<vmem>>, vector<1x4x32xf32>
    %202 = vector.shape_cast %201 : vector<1x4x32xf32> to vector<4x32xf32>
    %203 = vector.shape_cast %196 : vector<4x32xf32> to vector<1x4x32xf32>
    tpu.vector_store %arg3[%200, %c0_97, %c0_98], %203 {strides = array<i32>} : memref<4x4x32xf32, #tpu.memory_space<vmem>>, vector<1x4x32xf32>,
    %c4_i32_99 = arith.constant 4 : i32
    %c0_100 = arith.constant 0 : index
    %c0_101 = arith.constant 0 : index
    %204 = vector.load %arg6[%c0_100, %c0_101] : memref<4x32xf32, #tpu.memory_space<vmem>>, vector<4x32xf32>
    %c0_102 = arith.constant 0 : index
    %c0_103 = arith.constant 0 : index
    %205 = vector.load %arg4[%c0_102, %c0_103] : memref<4x32xf32, #tpu.memory_space<vmem>>, vector<4x32xf32>
    tpu.vector_store %arg4[%c0_102, %c0_103], %204 {strides = array<i32>} : memref<4x32xf32, #tpu.memory_space<vmem>>, vector<4x32xf32>,
    return
  }
  func.func @transform_0(%arg0: i32) -> (i32, i32, i32) {
    %c0_i32 = arith.constant 0 : i32
    %c0_i32_0 = arith.constant 0 : i32
    %c0_i32_1 = arith.constant 0 : i32
    return %arg0, %c0_i32, %c0_i32_0 : i32, i32, i32
  }
  func.func @transform_1(%arg0: i32) -> (i32, i32) {
    %c0_i32 = arith.constant 0 : i32
    %c0_i32_0 = arith.constant 0 : i32
    %c0_i32_1 = arith.constant 0 : i32
    return %c0_i32, %c0_i32_0 : i32, i32
  }
  func.func @transform_2(%arg0: i32) -> (i32, i32, i32) {
    %c0_i32 = arith.constant 0 : i32
    %c0_i32_0 = arith.constant 0 : i32
    %c0_i32_1 = arith.constant 0 : i32
    return %arg0, %c0_i32, %c0_i32_0 : i32, i32, i32
  }
  func.func @transform_3(%arg0: i32) -> (i32, i32) {
    %c0_i32 = arith.constant 0 : i32
    %c0_i32_0 = arith.constant 0 : i32
    %c0_i32_1 = arith.constant 0 : i32
    return %c0_i32, %c0_i32_0 : i32, i32
  }
}

module attributes {stable_mosaic.version = 11 : i64} {
  func.func @lstm_rec_kernel(%arg0: i32, %arg1: memref<4x4x128xf32, #tpu.memory_space<vmem>>, %arg2: memref<32x128xbf16, #tpu.memory_space<vmem>>, %arg3: memref<4x4x32xbf16, #tpu.memory_space<vmem>>, %arg4: memref<4x32xf32, #tpu.memory_space<vmem>>, %arg5: memref<4x32xf32, #tpu.memory_space<vmem>>, %arg6: memref<4x32xf32, #tpu.memory_space<vmem>>) attributes {dimension_semantics = [#tpu.dimension_semantics<arbitrary>], iteration_bounds = array<i64: 3>, scalar_prefetch = 0 : i64, scratch_operands = 2 : i64, tpu.core_type = #tpu.core_type<tc>, window_params = [{transform_indices = @transform_0, window_bounds = array<i64: 4, 4, 128>}, {pipeline_mode = #tpu.pipeline_mode<synchronous>, transform_indices = @transform_1, window_bounds = array<i64: 32, 128>}, {transform_indices = @transform_2, window_bounds = array<i64: 4, 4, 32>}, {pipeline_mode = #tpu.pipeline_mode<synchronous>, transform_indices = @transform_3, window_bounds = array<i64: 4, 32>}]} {
    %c0_i32 = arith.constant 0 : i32
    %0 = arith.cmpi eq, %arg0, %c0_i32 : i32
    %1 = arith.extui %0 : i1 to i32
    %c0_i32_0 = arith.constant 0 : i32
    %2 = arith.cmpi ne, %1, %c0_i32_0 : i32
    scf.if %2 {
      %cst_104 = arith.constant 0.000000e+00 : f32
      %210 = vector.broadcast %cst_104 : f32 to vector<4x32xf32>
      %c0_105 = arith.constant 0 : index
      %c0_106 = arith.constant 0 : index
      %211 = vector.load %arg5[%c0_105, %c0_106] : memref<4x32xf32, #tpu.memory_space<vmem>>, vector<4x32xf32>
      tpu.vector_store %arg5[%c0_105, %c0_106], %210 {strides = array<i32>} : memref<4x32xf32, #tpu.memory_space<vmem>>, vector<4x32xf32>,
      %cst_107 = arith.constant 0.000000e+00 : f32
      %212 = vector.broadcast %cst_107 : f32 to vector<4x32xf32>
      %c0_108 = arith.constant 0 : index
      %c0_109 = arith.constant 0 : index
      %213 = vector.load %arg6[%c0_108, %c0_109] : memref<4x32xf32, #tpu.memory_space<vmem>>, vector<4x32xf32>
      tpu.vector_store %arg6[%c0_108, %c0_109], %212 {strides = array<i32>} : memref<4x32xf32, #tpu.memory_space<vmem>>, vector<4x32xf32>,
    } else {
    }
    %c4_i32 = arith.constant 4 : i32
    %3 = arith.muli %arg0, %c4_i32 : i32
    %c0_i32_1 = arith.constant 0 : i32
    %c0 = arith.constant 0 : index
    %c0_2 = arith.constant 0 : index
    %4 = vector.load %arg5[%c0, %c0_2] : memref<4x32xf32, #tpu.memory_space<vmem>>, vector<4x32xf32>
    %c0_3 = arith.constant 0 : index
    %c0_4 = arith.constant 0 : index
    %5 = vector.load %arg6[%c0_3, %c0_4] : memref<4x32xf32, #tpu.memory_space<vmem>>, vector<4x32xf32>
    %6 = arith.index_cast %c0_i32_1 : i32 to index
    %c0_5 = arith.constant 0 : index
    %c0_6 = arith.constant 0 : index
    %7 = vector.load %arg1[%6, %c0_5, %c0_6] : memref<4x4x128xf32, #tpu.memory_space<vmem>>, vector<1x4x128xf32>
    %8 = vector.shape_cast %7 : vector<1x4x128xf32> to vector<4x128xf32>
    %9 = arith.truncf %4 : vector<4x32xf32> to vector<4x32xbf16>
    %c0_7 = arith.constant 0 : index
    %c0_8 = arith.constant 0 : index
    %10 = vector.load %arg2[%c0_7, %c0_8] : memref<32x128xbf16, #tpu.memory_space<vmem>>, vector<32x128xbf16>
    %cst = arith.constant dense<0.000000e+00> : vector<4x128xf32>
    %11 = tpu.matmul %9, %10, %cst {dimension_numbers = #tpu.dot_dimension_numbers<[1], [0], [0], [1], [0, 0, 1, 1], [], []>} : vector<4x32xbf16>, vector<32x128xbf16>, vector<4x128xf32> -> vector<4x128xf32>
    %12 = arith.addf %8, %11 : vector<4x128xf32>
    %13 = vector.extract_strided_slice %12 {offsets = [0, 0], sizes = [4, 32], strides = [1, 1]} : vector<4x128xf32> to vector<4x32xf32>
    %cst_9 = arith.constant 5.000000e-01 : f32
    %14 = vector.broadcast %cst_9 : f32 to vector<4x32xf32>
    %15 = arith.mulf %14, %13 : vector<4x32xf32>
    %16 = math.tanh %15 : vector<4x32xf32>
    %cst_10 = arith.constant 5.000000e-01 : f32
    %17 = vector.broadcast %cst_10 : f32 to vector<4x32xf32>
    %18 = arith.mulf %17, %16 : vector<4x32xf32>
    %cst_11 = arith.constant 5.000000e-01 : f32
    %19 = vector.broadcast %cst_11 : f32 to vector<4x32xf32>
    %20 = arith.addf %18, %19 : vector<4x32xf32>
    %21 = vector.extract_strided_slice %12 {offsets = [0, 32], sizes = [4, 32], strides = [1, 1]} : vector<4x128xf32> to vector<4x32xf32>
    %cst_12 = arith.constant 5.000000e-01 : f32
    %22 = vector.broadcast %cst_12 : f32 to vector<4x32xf32>
    %23 = arith.mulf %22, %21 : vector<4x32xf32>
    %24 = math.tanh %23 : vector<4x32xf32>
    %cst_13 = arith.constant 5.000000e-01 : f32
    %25 = vector.broadcast %cst_13 : f32 to vector<4x32xf32>
    %26 = arith.mulf %25, %24 : vector<4x32xf32>
    %cst_14 = arith.constant 5.000000e-01 : f32
    %27 = vector.broadcast %cst_14 : f32 to vector<4x32xf32>
    %28 = arith.addf %26, %27 : vector<4x32xf32>
    %29 = vector.extract_strided_slice %12 {offsets = [0, 64], sizes = [4, 32], strides = [1, 1]} : vector<4x128xf32> to vector<4x32xf32>
    %30 = math.tanh %29 : vector<4x32xf32>
    %31 = vector.extract_strided_slice %12 {offsets = [0, 96], sizes = [4, 32], strides = [1, 1]} : vector<4x128xf32> to vector<4x32xf32>
    %cst_15 = arith.constant 5.000000e-01 : f32
    %32 = vector.broadcast %cst_15 : f32 to vector<4x32xf32>
    %33 = arith.mulf %32, %31 : vector<4x32xf32>
    %34 = math.tanh %33 : vector<4x32xf32>
    %cst_16 = arith.constant 5.000000e-01 : f32
    %35 = vector.broadcast %cst_16 : f32 to vector<4x32xf32>
    %36 = arith.mulf %35, %34 : vector<4x32xf32>
    %cst_17 = arith.constant 5.000000e-01 : f32
    %37 = vector.broadcast %cst_17 : f32 to vector<4x32xf32>
    %38 = arith.addf %36, %37 : vector<4x32xf32>
    %39 = arith.mulf %28, %5 : vector<4x32xf32>
    %40 = arith.mulf %20, %30 : vector<4x32xf32>
    %41 = arith.addf %39, %40 : vector<4x32xf32>
    %42 = math.tanh %41 : vector<4x32xf32>
    %43 = arith.mulf %38, %42 : vector<4x32xf32>
    %44 = arith.addi %3, %c0_i32_1 : i32
    %c10_i32 = arith.constant 10 : i32
    %45 = arith.cmpi slt, %44, %c10_i32 : i32
    %46 = arith.select %45, %43, %4 : vector<4x32xf32>
    %47 = arith.select %45, %41, %5 : vector<4x32xf32>
    %c0_18 = arith.constant 0 : index
    %c0_19 = arith.constant 0 : index
    %48 = vector.load %arg5[%c0_18, %c0_19] : memref<4x32xf32, #tpu.memory_space<vmem>>, vector<4x32xf32>
    tpu.vector_store %arg5[%c0_18, %c0_19], %46 {strides = array<i32>} : memref<4x32xf32, #tpu.memory_space<vmem>>, vector<4x32xf32>,
    %c0_20 = arith.constant 0 : index
    %c0_21 = arith.constant 0 : index
    %49 = vector.load %arg6[%c0_20, %c0_21] : memref<4x32xf32, #tpu.memory_space<vmem>>, vector<4x32xf32>
    tpu.vector_store %arg6[%c0_20, %c0_21], %47 {strides = array<i32>} : memref<4x32xf32, #tpu.memory_space<vmem>>, vector<4x32xf32>,
    %50 = arith.truncf %46 : vector<4x32xf32> to vector<4x32xbf16>
    %51 = arith.index_cast %c0_i32_1 : i32 to index
    %c0_22 = arith.constant 0 : index
    %c0_23 = arith.constant 0 : index
    %52 = vector.load %arg3[%51, %c0_22, %c0_23] : memref<4x4x32xbf16, #tpu.memory_space<vmem>>, vector<1x4x32xbf16>
    %53 = vector.shape_cast %52 : vector<1x4x32xbf16> to vector<4x32xbf16>
    %54 = vector.shape_cast %50 : vector<4x32xbf16> to vector<1x4x32xbf16>
    tpu.vector_store %arg3[%51, %c0_22, %c0_23], %54 {strides = array<i32>} : memref<4x4x32xbf16, #tpu.memory_space<vmem>>, vector<1x4x32xbf16>,
    %c1_i32 = arith.constant 1 : i32
    %c0_24 = arith.constant 0 : index
    %c0_25 = arith.constant 0 : index
    %55 = vector.load %arg5[%c0_24, %c0_25] : memref<4x32xf32, #tpu.memory_space<vmem>>, vector<4x32xf32>
    %c0_26 = arith.constant 0 : index
    %c0_27 = arith.constant 0 : index
    %56 = vector.load %arg6[%c0_26, %c0_27] : memref<4x32xf32, #tpu.memory_space<vmem>>, vector<4x32xf32>
    %57 = arith.index_cast %c1_i32 : i32 to index
    %c0_28 = arith.constant 0 : index
    %c0_29 = arith.constant 0 : index
    %58 = vector.load %arg1[%57, %c0_28, %c0_29] : memref<4x4x128xf32, #tpu.memory_space<vmem>>, vector<1x4x128xf32>
    %59 = vector.shape_cast %58 : vector<1x4x128xf32> to vector<4x128xf32>
    %60 = arith.truncf %55 : vector<4x32xf32> to vector<4x32xbf16>
    %c0_30 = arith.constant 0 : index
    %c0_31 = arith.constant 0 : index
    %61 = vector.load %arg2[%c0_30, %c0_31] : memref<32x128xbf16, #tpu.memory_space<vmem>>, vector<32x128xbf16>
    %cst_32 = arith.constant dense<0.000000e+00> : vector<4x128xf32>
    %62 = tpu.matmul %60, %61, %cst_32 {dimension_numbers = #tpu.dot_dimension_numbers<[1], [0], [0], [1], [0, 0, 1, 1], [], []>} : vector<4x32xbf16>, vector<32x128xbf16>, vector<4x128xf32> -> vector<4x128xf32>
    %63 = arith.addf %59, %62 : vector<4x128xf32>
    %64 = vector.extract_strided_slice %63 {offsets = [0, 0], sizes = [4, 32], strides = [1, 1]} : vector<4x128xf32> to vector<4x32xf32>
    %cst_33 = arith.constant 5.000000e-01 : f32
    %65 = vector.broadcast %cst_33 : f32 to vector<4x32xf32>
    %66 = arith.mulf %65, %64 : vector<4x32xf32>
    %67 = math.tanh %66 : vector<4x32xf32>
    %cst_34 = arith.constant 5.000000e-01 : f32
    %68 = vector.broadcast %cst_34 : f32 to vector<4x32xf32>
    %69 = arith.mulf %68, %67 : vector<4x32xf32>
    %cst_35 = arith.constant 5.000000e-01 : f32
    %70 = vector.broadcast %cst_35 : f32 to vector<4x32xf32>
    %71 = arith.addf %69, %70 : vector<4x32xf32>
    %72 = vector.extract_strided_slice %63 {offsets = [0, 32], sizes = [4, 32], strides = [1, 1]} : vector<4x128xf32> to vector<4x32xf32>
    %cst_36 = arith.constant 5.000000e-01 : f32
    %73 = vector.broadcast %cst_36 : f32 to vector<4x32xf32>
    %74 = arith.mulf %73, %72 : vector<4x32xf32>
    %75 = math.tanh %74 : vector<4x32xf32>
    %cst_37 = arith.constant 5.000000e-01 : f32
    %76 = vector.broadcast %cst_37 : f32 to vector<4x32xf32>
    %77 = arith.mulf %76, %75 : vector<4x32xf32>
    %cst_38 = arith.constant 5.000000e-01 : f32
    %78 = vector.broadcast %cst_38 : f32 to vector<4x32xf32>
    %79 = arith.addf %77, %78 : vector<4x32xf32>
    %80 = vector.extract_strided_slice %63 {offsets = [0, 64], sizes = [4, 32], strides = [1, 1]} : vector<4x128xf32> to vector<4x32xf32>
    %81 = math.tanh %80 : vector<4x32xf32>
    %82 = vector.extract_strided_slice %63 {offsets = [0, 96], sizes = [4, 32], strides = [1, 1]} : vector<4x128xf32> to vector<4x32xf32>
    %cst_39 = arith.constant 5.000000e-01 : f32
    %83 = vector.broadcast %cst_39 : f32 to vector<4x32xf32>
    %84 = arith.mulf %83, %82 : vector<4x32xf32>
    %85 = math.tanh %84 : vector<4x32xf32>
    %cst_40 = arith.constant 5.000000e-01 : f32
    %86 = vector.broadcast %cst_40 : f32 to vector<4x32xf32>
    %87 = arith.mulf %86, %85 : vector<4x32xf32>
    %cst_41 = arith.constant 5.000000e-01 : f32
    %88 = vector.broadcast %cst_41 : f32 to vector<4x32xf32>
    %89 = arith.addf %87, %88 : vector<4x32xf32>
    %90 = arith.mulf %79, %56 : vector<4x32xf32>
    %91 = arith.mulf %71, %81 : vector<4x32xf32>
    %92 = arith.addf %90, %91 : vector<4x32xf32>
    %93 = math.tanh %92 : vector<4x32xf32>
    %94 = arith.mulf %89, %93 : vector<4x32xf32>
    %95 = arith.addi %3, %c1_i32 : i32
    %c10_i32_42 = arith.constant 10 : i32
    %96 = arith.cmpi slt, %95, %c10_i32_42 : i32
    %97 = arith.select %96, %94, %55 : vector<4x32xf32>
    %98 = arith.select %96, %92, %56 : vector<4x32xf32>
    %c0_43 = arith.constant 0 : index
    %c0_44 = arith.constant 0 : index
    %99 = vector.load %arg5[%c0_43, %c0_44] : memref<4x32xf32, #tpu.memory_space<vmem>>, vector<4x32xf32>
    tpu.vector_store %arg5[%c0_43, %c0_44], %97 {strides = array<i32>} : memref<4x32xf32, #tpu.memory_space<vmem>>, vector<4x32xf32>,
    %c0_45 = arith.constant 0 : index
    %c0_46 = arith.constant 0 : index
    %100 = vector.load %arg6[%c0_45, %c0_46] : memref<4x32xf32, #tpu.memory_space<vmem>>, vector<4x32xf32>
    tpu.vector_store %arg6[%c0_45, %c0_46], %98 {strides = array<i32>} : memref<4x32xf32, #tpu.memory_space<vmem>>, vector<4x32xf32>,
    %101 = arith.truncf %97 : vector<4x32xf32> to vector<4x32xbf16>
    %102 = arith.index_cast %c1_i32 : i32 to index
    %c0_47 = arith.constant 0 : index
    %c0_48 = arith.constant 0 : index
    %103 = vector.load %arg3[%102, %c0_47, %c0_48] : memref<4x4x32xbf16, #tpu.memory_space<vmem>>, vector<1x4x32xbf16>
    %104 = vector.shape_cast %103 : vector<1x4x32xbf16> to vector<4x32xbf16>
    %105 = vector.shape_cast %101 : vector<4x32xbf16> to vector<1x4x32xbf16>
    tpu.vector_store %arg3[%102, %c0_47, %c0_48], %105 {strides = array<i32>} : memref<4x4x32xbf16, #tpu.memory_space<vmem>>, vector<1x4x32xbf16>,
    %c2_i32 = arith.constant 2 : i32
    %c0_49 = arith.constant 0 : index
    %c0_50 = arith.constant 0 : index
    %106 = vector.load %arg5[%c0_49, %c0_50] : memref<4x32xf32, #tpu.memory_space<vmem>>, vector<4x32xf32>
    %c0_51 = arith.constant 0 : index
    %c0_52 = arith.constant 0 : index
    %107 = vector.load %arg6[%c0_51, %c0_52] : memref<4x32xf32, #tpu.memory_space<vmem>>, vector<4x32xf32>
    %108 = arith.index_cast %c2_i32 : i32 to index
    %c0_53 = arith.constant 0 : index
    %c0_54 = arith.constant 0 : index
    %109 = vector.load %arg1[%108, %c0_53, %c0_54] : memref<4x4x128xf32, #tpu.memory_space<vmem>>, vector<1x4x128xf32>
    %110 = vector.shape_cast %109 : vector<1x4x128xf32> to vector<4x128xf32>
    %111 = arith.truncf %106 : vector<4x32xf32> to vector<4x32xbf16>
    %c0_55 = arith.constant 0 : index
    %c0_56 = arith.constant 0 : index
    %112 = vector.load %arg2[%c0_55, %c0_56] : memref<32x128xbf16, #tpu.memory_space<vmem>>, vector<32x128xbf16>
    %cst_57 = arith.constant dense<0.000000e+00> : vector<4x128xf32>
    %113 = tpu.matmul %111, %112, %cst_57 {dimension_numbers = #tpu.dot_dimension_numbers<[1], [0], [0], [1], [0, 0, 1, 1], [], []>} : vector<4x32xbf16>, vector<32x128xbf16>, vector<4x128xf32> -> vector<4x128xf32>
    %114 = arith.addf %110, %113 : vector<4x128xf32>
    %115 = vector.extract_strided_slice %114 {offsets = [0, 0], sizes = [4, 32], strides = [1, 1]} : vector<4x128xf32> to vector<4x32xf32>
    %cst_58 = arith.constant 5.000000e-01 : f32
    %116 = vector.broadcast %cst_58 : f32 to vector<4x32xf32>
    %117 = arith.mulf %116, %115 : vector<4x32xf32>
    %118 = math.tanh %117 : vector<4x32xf32>
    %cst_59 = arith.constant 5.000000e-01 : f32
    %119 = vector.broadcast %cst_59 : f32 to vector<4x32xf32>
    %120 = arith.mulf %119, %118 : vector<4x32xf32>
    %cst_60 = arith.constant 5.000000e-01 : f32
    %121 = vector.broadcast %cst_60 : f32 to vector<4x32xf32>
    %122 = arith.addf %120, %121 : vector<4x32xf32>
    %123 = vector.extract_strided_slice %114 {offsets = [0, 32], sizes = [4, 32], strides = [1, 1]} : vector<4x128xf32> to vector<4x32xf32>
    %cst_61 = arith.constant 5.000000e-01 : f32
    %124 = vector.broadcast %cst_61 : f32 to vector<4x32xf32>
    %125 = arith.mulf %124, %123 : vector<4x32xf32>
    %126 = math.tanh %125 : vector<4x32xf32>
    %cst_62 = arith.constant 5.000000e-01 : f32
    %127 = vector.broadcast %cst_62 : f32 to vector<4x32xf32>
    %128 = arith.mulf %127, %126 : vector<4x32xf32>
    %cst_63 = arith.constant 5.000000e-01 : f32
    %129 = vector.broadcast %cst_63 : f32 to vector<4x32xf32>
    %130 = arith.addf %128, %129 : vector<4x32xf32>
    %131 = vector.extract_strided_slice %114 {offsets = [0, 64], sizes = [4, 32], strides = [1, 1]} : vector<4x128xf32> to vector<4x32xf32>
    %132 = math.tanh %131 : vector<4x32xf32>
    %133 = vector.extract_strided_slice %114 {offsets = [0, 96], sizes = [4, 32], strides = [1, 1]} : vector<4x128xf32> to vector<4x32xf32>
    %cst_64 = arith.constant 5.000000e-01 : f32
    %134 = vector.broadcast %cst_64 : f32 to vector<4x32xf32>
    %135 = arith.mulf %134, %133 : vector<4x32xf32>
    %136 = math.tanh %135 : vector<4x32xf32>
    %cst_65 = arith.constant 5.000000e-01 : f32
    %137 = vector.broadcast %cst_65 : f32 to vector<4x32xf32>
    %138 = arith.mulf %137, %136 : vector<4x32xf32>
    %cst_66 = arith.constant 5.000000e-01 : f32
    %139 = vector.broadcast %cst_66 : f32 to vector<4x32xf32>
    %140 = arith.addf %138, %139 : vector<4x32xf32>
    %141 = arith.mulf %130, %107 : vector<4x32xf32>
    %142 = arith.mulf %122, %132 : vector<4x32xf32>
    %143 = arith.addf %141, %142 : vector<4x32xf32>
    %144 = math.tanh %143 : vector<4x32xf32>
    %145 = arith.mulf %140, %144 : vector<4x32xf32>
    %146 = arith.addi %3, %c2_i32 : i32
    %c10_i32_67 = arith.constant 10 : i32
    %147 = arith.cmpi slt, %146, %c10_i32_67 : i32
    %148 = arith.select %147, %145, %106 : vector<4x32xf32>
    %149 = arith.select %147, %143, %107 : vector<4x32xf32>
    %c0_68 = arith.constant 0 : index
    %c0_69 = arith.constant 0 : index
    %150 = vector.load %arg5[%c0_68, %c0_69] : memref<4x32xf32, #tpu.memory_space<vmem>>, vector<4x32xf32>
    tpu.vector_store %arg5[%c0_68, %c0_69], %148 {strides = array<i32>} : memref<4x32xf32, #tpu.memory_space<vmem>>, vector<4x32xf32>,
    %c0_70 = arith.constant 0 : index
    %c0_71 = arith.constant 0 : index
    %151 = vector.load %arg6[%c0_70, %c0_71] : memref<4x32xf32, #tpu.memory_space<vmem>>, vector<4x32xf32>
    tpu.vector_store %arg6[%c0_70, %c0_71], %149 {strides = array<i32>} : memref<4x32xf32, #tpu.memory_space<vmem>>, vector<4x32xf32>,
    %152 = arith.truncf %148 : vector<4x32xf32> to vector<4x32xbf16>
    %153 = arith.index_cast %c2_i32 : i32 to index
    %c0_72 = arith.constant 0 : index
    %c0_73 = arith.constant 0 : index
    %154 = vector.load %arg3[%153, %c0_72, %c0_73] : memref<4x4x32xbf16, #tpu.memory_space<vmem>>, vector<1x4x32xbf16>
    %155 = vector.shape_cast %154 : vector<1x4x32xbf16> to vector<4x32xbf16>
    %156 = vector.shape_cast %152 : vector<4x32xbf16> to vector<1x4x32xbf16>
    tpu.vector_store %arg3[%153, %c0_72, %c0_73], %156 {strides = array<i32>} : memref<4x4x32xbf16, #tpu.memory_space<vmem>>, vector<1x4x32xbf16>,
    %c3_i32 = arith.constant 3 : i32
    %c0_74 = arith.constant 0 : index
    %c0_75 = arith.constant 0 : index
    %157 = vector.load %arg5[%c0_74, %c0_75] : memref<4x32xf32, #tpu.memory_space<vmem>>, vector<4x32xf32>
    %c0_76 = arith.constant 0 : index
    %c0_77 = arith.constant 0 : index
    %158 = vector.load %arg6[%c0_76, %c0_77] : memref<4x32xf32, #tpu.memory_space<vmem>>, vector<4x32xf32>
    %159 = arith.index_cast %c3_i32 : i32 to index
    %c0_78 = arith.constant 0 : index
    %c0_79 = arith.constant 0 : index
    %160 = vector.load %arg1[%159, %c0_78, %c0_79] : memref<4x4x128xf32, #tpu.memory_space<vmem>>, vector<1x4x128xf32>
    %161 = vector.shape_cast %160 : vector<1x4x128xf32> to vector<4x128xf32>
    %162 = arith.truncf %157 : vector<4x32xf32> to vector<4x32xbf16>
    %c0_80 = arith.constant 0 : index
    %c0_81 = arith.constant 0 : index
    %163 = vector.load %arg2[%c0_80, %c0_81] : memref<32x128xbf16, #tpu.memory_space<vmem>>, vector<32x128xbf16>
    %cst_82 = arith.constant dense<0.000000e+00> : vector<4x128xf32>
    %164 = tpu.matmul %162, %163, %cst_82 {dimension_numbers = #tpu.dot_dimension_numbers<[1], [0], [0], [1], [0, 0, 1, 1], [], []>} : vector<4x32xbf16>, vector<32x128xbf16>, vector<4x128xf32> -> vector<4x128xf32>
    %165 = arith.addf %161, %164 : vector<4x128xf32>
    %166 = vector.extract_strided_slice %165 {offsets = [0, 0], sizes = [4, 32], strides = [1, 1]} : vector<4x128xf32> to vector<4x32xf32>
    %cst_83 = arith.constant 5.000000e-01 : f32
    %167 = vector.broadcast %cst_83 : f32 to vector<4x32xf32>
    %168 = arith.mulf %167, %166 : vector<4x32xf32>
    %169 = math.tanh %168 : vector<4x32xf32>
    %cst_84 = arith.constant 5.000000e-01 : f32
    %170 = vector.broadcast %cst_84 : f32 to vector<4x32xf32>
    %171 = arith.mulf %170, %169 : vector<4x32xf32>
    %cst_85 = arith.constant 5.000000e-01 : f32
    %172 = vector.broadcast %cst_85 : f32 to vector<4x32xf32>
    %173 = arith.addf %171, %172 : vector<4x32xf32>
    %174 = vector.extract_strided_slice %165 {offsets = [0, 32], sizes = [4, 32], strides = [1, 1]} : vector<4x128xf32> to vector<4x32xf32>
    %cst_86 = arith.constant 5.000000e-01 : f32
    %175 = vector.broadcast %cst_86 : f32 to vector<4x32xf32>
    %176 = arith.mulf %175, %174 : vector<4x32xf32>
    %177 = math.tanh %176 : vector<4x32xf32>
    %cst_87 = arith.constant 5.000000e-01 : f32
    %178 = vector.broadcast %cst_87 : f32 to vector<4x32xf32>
    %179 = arith.mulf %178, %177 : vector<4x32xf32>
    %cst_88 = arith.constant 5.000000e-01 : f32
    %180 = vector.broadcast %cst_88 : f32 to vector<4x32xf32>
    %181 = arith.addf %179, %180 : vector<4x32xf32>
    %182 = vector.extract_strided_slice %165 {offsets = [0, 64], sizes = [4, 32], strides = [1, 1]} : vector<4x128xf32> to vector<4x32xf32>
    %183 = math.tanh %182 : vector<4x32xf32>
    %184 = vector.extract_strided_slice %165 {offsets = [0, 96], sizes = [4, 32], strides = [1, 1]} : vector<4x128xf32> to vector<4x32xf32>
    %cst_89 = arith.constant 5.000000e-01 : f32
    %185 = vector.broadcast %cst_89 : f32 to vector<4x32xf32>
    %186 = arith.mulf %185, %184 : vector<4x32xf32>
    %187 = math.tanh %186 : vector<4x32xf32>
    %cst_90 = arith.constant 5.000000e-01 : f32
    %188 = vector.broadcast %cst_90 : f32 to vector<4x32xf32>
    %189 = arith.mulf %188, %187 : vector<4x32xf32>
    %cst_91 = arith.constant 5.000000e-01 : f32
    %190 = vector.broadcast %cst_91 : f32 to vector<4x32xf32>
    %191 = arith.addf %189, %190 : vector<4x32xf32>
    %192 = arith.mulf %181, %158 : vector<4x32xf32>
    %193 = arith.mulf %173, %183 : vector<4x32xf32>
    %194 = arith.addf %192, %193 : vector<4x32xf32>
    %195 = math.tanh %194 : vector<4x32xf32>
    %196 = arith.mulf %191, %195 : vector<4x32xf32>
    %197 = arith.addi %3, %c3_i32 : i32
    %c10_i32_92 = arith.constant 10 : i32
    %198 = arith.cmpi slt, %197, %c10_i32_92 : i32
    %199 = arith.select %198, %196, %157 : vector<4x32xf32>
    %200 = arith.select %198, %194, %158 : vector<4x32xf32>
    %c0_93 = arith.constant 0 : index
    %c0_94 = arith.constant 0 : index
    %201 = vector.load %arg5[%c0_93, %c0_94] : memref<4x32xf32, #tpu.memory_space<vmem>>, vector<4x32xf32>
    tpu.vector_store %arg5[%c0_93, %c0_94], %199 {strides = array<i32>} : memref<4x32xf32, #tpu.memory_space<vmem>>, vector<4x32xf32>,
    %c0_95 = arith.constant 0 : index
    %c0_96 = arith.constant 0 : index
    %202 = vector.load %arg6[%c0_95, %c0_96] : memref<4x32xf32, #tpu.memory_space<vmem>>, vector<4x32xf32>
    tpu.vector_store %arg6[%c0_95, %c0_96], %200 {strides = array<i32>} : memref<4x32xf32, #tpu.memory_space<vmem>>, vector<4x32xf32>,
    %203 = arith.truncf %199 : vector<4x32xf32> to vector<4x32xbf16>
    %204 = arith.index_cast %c3_i32 : i32 to index
    %c0_97 = arith.constant 0 : index
    %c0_98 = arith.constant 0 : index
    %205 = vector.load %arg3[%204, %c0_97, %c0_98] : memref<4x4x32xbf16, #tpu.memory_space<vmem>>, vector<1x4x32xbf16>
    %206 = vector.shape_cast %205 : vector<1x4x32xbf16> to vector<4x32xbf16>
    %207 = vector.shape_cast %203 : vector<4x32xbf16> to vector<1x4x32xbf16>
    tpu.vector_store %arg3[%204, %c0_97, %c0_98], %207 {strides = array<i32>} : memref<4x4x32xbf16, #tpu.memory_space<vmem>>, vector<1x4x32xbf16>,
    %c4_i32_99 = arith.constant 4 : i32
    %c0_100 = arith.constant 0 : index
    %c0_101 = arith.constant 0 : index
    %208 = vector.load %arg6[%c0_100, %c0_101] : memref<4x32xf32, #tpu.memory_space<vmem>>, vector<4x32xf32>
    %c0_102 = arith.constant 0 : index
    %c0_103 = arith.constant 0 : index
    %209 = vector.load %arg4[%c0_102, %c0_103] : memref<4x32xf32, #tpu.memory_space<vmem>>, vector<4x32xf32>
    tpu.vector_store %arg4[%c0_102, %c0_103], %208 {strides = array<i32>} : memref<4x32xf32, #tpu.memory_space<vmem>>, vector<4x32xf32>,
    return
  }
  func.func @transform_0(%arg0: i32) -> (i32, i32, i32) {
    %c0_i32 = arith.constant 0 : i32
    %c0_i32_0 = arith.constant 0 : i32
    %c0_i32_1 = arith.constant 0 : i32
    return %arg0, %c0_i32, %c0_i32_0 : i32, i32, i32
  }
  func.func @transform_1(%arg0: i32) -> (i32, i32) {
    %c0_i32 = arith.constant 0 : i32
    %c0_i32_0 = arith.constant 0 : i32
    %c0_i32_1 = arith.constant 0 : i32
    return %c0_i32, %c0_i32_0 : i32, i32
  }
  func.func @transform_2(%arg0: i32) -> (i32, i32, i32) {
    %c0_i32 = arith.constant 0 : i32
    %c0_i32_0 = arith.constant 0 : i32
    %c0_i32_1 = arith.constant 0 : i32
    return %arg0, %c0_i32, %c0_i32_0 : i32, i32, i32
  }
  func.func @transform_3(%arg0: i32) -> (i32, i32) {
    %c0_i32 = arith.constant 0 : i32
    %c0_i32_0 = arith.constant 0 : i32
    %c0_i32_1 = arith.constant 0 : i32
    return %c0_i32, %c0_i32_0 : i32, i32
  }
}

</mosaic_0001>

<bundles_post_ra>
// kernel: encoder_forward.8
= control target key start
LH: loop header
LB: loop body
LE: loop exit
PB: predicated region body
PF: predicated region fallthrough
CT: control target
= control target key end

     0   :  { %s342_s12 = smov 0   ;;  %s368_s0 = inlined_call_operand.vmem [shape: bf16[48,32], index: 0, kind: input, shape index: {}]   ;;  %s369_s1 = inlined_call_operand.vmem [shape: bf16[32,128], index: 1, kind: input, shape index: {}]   ;;  %s370_s2 = inlined_call_operand.vmem [shape: f32[1,128], index: 2, kind: input, shape index: {}]   ;;  %s371_s3 = inlined_call_operand.vmem [shape: f32[48,128], index: 3, kind: output, shape index: {}]  }
   0x1 LB: > { %s278_s13 = sadd.s32 4294967295, %s320_s12   ;;  %p282_p0 = scmp.ge.s32.totalorder %s320_s12, 1  ;;  %s320_s12 = sphi %s342_s12, %s13_s12  }
   0x2   : > { %p138_p1 = scmp.lt.s32.totalorder %s320_s12, 4 }
   0x4   : > { %p139_p2 = pnand %p282_p0, %p138_p1 }
   0x5   : > { %s283_s16 = sshll.u32 (!%p139_p2), %s278_s13, 1 }
   0x6   : > { %142 = sbr.rel (%p139_p2) target bundleno = 156 (0x9c), region = 32  ;;  %p163_p3 = scmp.lt.s32.totalorder (!%p139_p2), %s283_s16, 5 }
   0xb   : > { %v304_v0 = vld [vmem:[%s369_s1 + $0x8] sm:$0xff]  ;;  %v303_v1 = vld [vmem:[%s369_s1] sm:$0xff]  ;;  %s373_s16 = smov (!%p163_p3, %s283_s16), 5  ;;  %vm202_vm0 = vcmask 261120  }
   0xc   : > { %212 = vmatpush.bf16.msra.mxu0 %v304_v0  ;;  %s284_s19 = sshll.u32 %s373_s16, 2  ;;  %s286_s23 = sshll.u32 %s373_s16, 3  ;;  %v313_v3 = vld [vmem:[%s370_s2] ss:$0 sm:$0xff] }
   0xd   : > { %s166_s22 = scalar_lea.vmem %s368_s0, %s284_s19  ;;  %s172_s28 = scalar_lea.vmem %s371_s3, %s286_s23 }
   0xe   : > { %v302_v2 = vld [vmem:[%s166_s22] sm:$0xff] }
  0x10   : > { %213 = vmatpush.bf16.msra.mxu0 %v303_v1 }
  0x13   : > { %299 = vmatmul.msk.bf16.vlgmr.msra.gmra.mxu0 %vm202_vm0, %v302_v2 }
  0x90   : > { %v215_v4 = vpop.f32.mrf.mxu0 }
  0x91   : > { %v216_v5 = vadd.f32 %v313_v3, %v215_v4 }
  0x93   : > { %220 = vst [vmem:[%s172_s28] sm:$0xff] %v216_v5 }
  0x98   : > { %v217_v6 = vpop.f32.mrf.mxu0 }
  0x99   : > { %v218_v7 = vadd.f32 %v313_v3, %v217_v6 }
  0x9b   : > { %221 = vst [vmem:[%s172_s28 + $0x8] sm:$0xff] %v218_v7 }
  0x9c PF: > { %s13_s12 = sadd.s32 1, %s320_s12  }
  0x9d   : > { %p10_p4 = scmp.ge.s32.totalorder %s13_s12, 5  }
  0x9f   :  { %12 = sbr.rel (!%p10_p4) target bundleno = 1 (0x1), region = 62 }

// kernel: encoder_forward.15
= control target key start
LH: loop header
LB: loop body
LE: loop exit
PB: predicated region body
PF: predicated region fallthrough
CT: control target
= control target key end

     0   :  { %s723_s12 = smov 0   ;;  %s832_s0 = inlined_call_operand.vmem [shape: f32[12,4,128], index: 0, kind: input, shape index: {}]   ;;  %s833_s1 = inlined_call_operand.vmem [shape: bf16[32,128], index: 1, kind: input, shape index: {}]   ;;  %s834_s2 = inlined_call_operand.vmem [shape: f32[12,4,32], index: 2, kind: output, shape index: {0}]   ;;  %s835_s3 = inlined_call_operand.vmem [shape: f32[4,32], index: 3, kind: output, shape index: {1}]  }
   0x1 LB: > { %s592_s13 = sadd.s32 4294967295, %s697_s12   ;;  %p596_p0 = scmp.ge.s32.totalorder %s697_s12, 1  ;;  %s697_s12 = sphi %s723_s12, %s14_s12  }
   0x2   : > { %p136_p1 = scmp.lt.s32.totalorder %s697_s12, 4 }
   0x4   : > { %p137_p2 = pnand %p596_p0, %p136_p1 }
   0x5   : > { %s731_s14 = sshll.u32 (!%p137_p2), %s592_s13, 2  ;;  %p601_p4 = scmp.ne.s32.totalorder (!%p137_p2), %s592_s13, 0 }
   0x6   : > { %140 = sbr.rel (%p137_p2) target bundleno = 2412 (0x96c), region = 28  ;;  %p161_p3 = scmp.lt.s32.totalorder (!%p137_p2), %s731_s14, 11 }
   0xb   : > { %s162_s15 = scalar_select %p161_p3, %s731_s14, 11 }
   0xc   : > { %176 = sbr.rel (%p601_p4) target bundleno = 20 (0x14), region = 32 }
   0xd   : > { %s598_s16 = sshll.u32 %s162_s15, 2 }
   0xe   : > { %s738_s19 = scalar_lea.vmem %s832_s0, %s598_s16  ;;  %s743_s22 = scalar_lea.vmem %s834_s2, %s598_s16 }
  0x11   : > { %vm177_vm0 = vcmask 257024   ;;  %v699_v0 = vmov 0.0  }
  0x12   : > { %178 = vst.msk [vmem:[#allocation2] sm:$0xf] %vm177_vm0, %v699_v0 }
  0x13   : > { %179 = vst.msk [vmem:[#allocation3] sm:$0xf] %vm177_vm0, %v699_v0 }
  0x14 PF: > { %v648_v1 = vld [vmem:[%s833_s1 + $0x8] sm:$0xff]  ;;  %v647_v2 = vld [vmem:[%s833_s1] sm:$0xff]  ;;  %vm201_vm1 = vcmask 261120   ;;  %s700_s27 = smov 64   ;;  %s701_s28 = smov 32   ;;  %vm259_vm3 = vcmask 257024  }
  0x15   : > { %211 = vmatpush.bf16.msra.mxu0 %v648_v1  ;;  %v183_v5 = vld [vmem:[%s738_s19] sm:$0xf]  ;;  %s702_s29 = smov 96   ;;  %p245_p5 = scmp.lt.s32.totalorder %s731_s14, 10  ;;  %v650_v30 = vld [vmem:[%s833_s1 + $0x8] sm:$0xff] }
  0x16   : > { %297 = vmatpush.bf16.msra.mxu1 %v650_v30  ;;  %v649_v31 = vld [vmem:[%s833_s1] sm:$0xff]  ;;  %s331_s8 = sadd.s32 1, %s731_s14  ;;  %v652_v59 = vld [vmem:[%s833_s1 + $0x8] sm:$0xff]  ;;  %s418_s16 = sadd.s32 2, %s731_s14 }
  0x17   : > { %s246_s30 = scalar_select %p245_p5, 1, 0  ;;  %v612_v35 = vld [vmem:[%s738_s19 + $0x4] sm:$0xf]  ;;  %384 = vmatpush.bf16.msra.mxu2 %v652_v59  ;;  %v623_v0 = vld [vmem:[%s738_s19 + $0x8] sm:$0xf] }
  0x18   : > { %p332_p6 = scmp.lt.s32.totalorder %s331_s8, 10  ;;  %v651_v60 = vld [vmem:[%s833_s1] sm:$0xff]  ;;  %p419_p7 = scmp.lt.s32.totalorder %s418_s16, 10 }
  0x19   : > { %v181_v3 = vld [vmem:[#allocation2] sm:$0xf]  ;;  %212 = vmatpush.bf16.msra.mxu0 %v647_v2  ;;  %v247_v18 = vstv %s246_s30  ;;  %s505_s24 = sadd.s32 3, %s731_s14 }
  0x1a   : > { %v184_v4 = vpack.c.bf16 %v181_v3, %v181_v3  ;;  %v182_v10 = vld [vmem:[#allocation3] sm:$0xf]  ;;  %250 = vrot.lane.b32.xlu2 %v181_v3, %s702_s29  ;;  %vm248_vm2 = vcmp.eq.s32.totalorder %v247_v18, 1  ;;  %298 = vmatpush.bf16.msra.mxu1 %v649_v31  ;;  %s333_s9 = scalar_select %p332_p6, 1, 0 }
  0x1b   : > { %385 = vmatpush.bf16.msra.mxu2 %v651_v60  ;;  %s420_s17 = scalar_select %p419_p7, 1, 0 }
  0x1c   : > { %611 = vmatmul.msk.bf16.vlgmr.msra.gmra.mxu0 %vm201_vm1, %v184_v4  ;;  %v334_v51 = vstv %s333_s9  ;;  %p506_p8 = scmp.lt.s32.totalorder %s505_s24, 10 }
  0x1d   : > { %vm335_vm4 = vcmp.eq.s32.totalorder %v334_v51, 1 }
  0x1e   : > { %s507_s25 = scalar_select %p506_p8, 1, 0 }
  0x74   : > { %v251_v26 = vpop.permute.xlu2 %250 }
  0x99   : > { %v214_v6 = vpop.f32.mrf.mxu0 }
  0x9a   : > { %v218_v7 = vadd.f32 %v214_v6, %v183_v5 }
  0x9c   : > { %667 = vtanh.f32 %v218_v7  ;;  %v219_v11 = vmul.f32 0.5, %v218_v7 }
  0x9e   : > { %669 = vtanh.f32 %v219_v11 }
  0xa1   : > { %v216_v8 = vpop.f32.mrf.mxu0 }
  0xa2   : > { %v668_v9 = vpop.eup %667 }
  0xa3   : > { %230 = vrot.lane.b32.xlu0 %v668_v9, %s700_s27 }
  0xa4   : > { %v670_v12 = vpop.eup %669 }
  0xa5   : > { %v221_v13 = vmul.f32 0.5, %v670_v12 }
  0xa7   : > { %v222_v14 = vadd.f32 0.5, %v221_v13 }
  0xab   : > { %225 = vrot.lane.b32.xlu0 %v182_v10, %s701_s28 }
 0x115   : > { %v231_v15 = vpop.permute.xlu0 %230 }
 0x116   : > { %v233_v16 = vmul.f32 %v231_v15, %v222_v14 }
 0x118   : > { %235 = vrot.lane.b32.xlu1 %v233_v16, %s701_s28  ;;  %v421_v16 = vstv %s420_s17 }
 0x119   : > { %vm422_vm5 = vcmp.eq.s32.totalorder %v421_v16, 1 }
 0x11d   : > { %v226_v17 = vpop.permute.xlu0 %225 }
 0x11e   : > { %v228_v19 = vmul.f32 %v226_v17, %v222_v14 }
 0x18a   : > { %v236_v20 = vpop.permute.xlu1 %235 }
 0x18b   : > { %v238_v21 = vadd.f32 %v236_v20, %v228_v19 }
 0x18d   : > { %671 = vtanh.f32 %v238_v21  ;;  %v254_v22 = vsel %vm248_vm2, %v238_v21, %v226_v17 }
 0x18e   : > { %262 = vrot.lane.b32.xlu0 %v254_v22, %s702_s29 }
 0x193   : > { %v672_v23 = vpop.eup %671 }
 0x194   : > { %241 = vrot.lane.b32.xlu1 %v672_v23, %s700_s27 }
 0x200   : > { %v263_v24 = vpop.permute.xlu0 %262 }
 0x201   : > { %265 = vst.msk [vmem:[#allocation3] sm:$0xf] %vm259_vm3, %v263_v24  ;;  %v654_v24 = vld [vmem:[%s833_s1 + $0x8] sm:$0xff] }
 0x202   : > { %471 = vmatpush.bf16.msra.mxu3 %v654_v24 }
 0x206   : > { %v242_v25 = vpop.permute.xlu1 %241 }
 0x207   : > { %v244_v27 = vmul.f32 %v242_v25, %v222_v14  ;;  %v653_v25 = vld [vmem:[%s833_s1] sm:$0xff] }
 0x208   : > { %v268_v29 = vld [vmem:[#allocation3] sm:$0xf]  ;;  %472 = vmatpush.bf16.msra.mxu3 %v653_v25 }
 0x209   : > { %v253_v28 = vsel %vm248_vm2, %v244_v27, %v251_v26 }
 0x20a   : > { %256 = vrot.lane.b32.xlu2 %v253_v28, %s701_s28 }
 0x212   : > { %311 = vrot.lane.b32.xlu2 %v268_v29, %s701_s28  ;;  %v634_v29 = vld [vmem:[%s738_s19 + $0xc] sm:$0xf] }
 0x264   : > { %v257_v32 = vpop.permute.xlu2 %256 }
 0x265   : > { %260 = vst.msk [vmem:[#allocation2] sm:$0xf] %vm259_vm3, %v257_v32 }
 0x266   : > { %266 = vst.msk [vmem:[%s743_s22] sm:$0xf] %vm259_vm3, %v257_v32 }
 0x26c   : > { %v267_v33 = vld [vmem:[#allocation2] sm:$0xf]  ;;  %v312_v46 = vpop.permute.xlu2 %311 }
 0x26d   : > { %337 = vrot.lane.b32.xlu2 %v267_v33, %s702_s29  ;;  %v271_v34 = vpack.c.bf16 %v267_v33, %v267_v33 }
 0x26f   : > { %621 = vmatmul.msk.bf16.vlgmr.msra.gmra.mxu1 %vm201_vm1, %v271_v34 }
 0x2c7   : > { %v338_v55 = vpop.permute.xlu2 %337 }
 0x2ec   : > { %v300_v36 = vpop.f32.mrf.mxu1 }
 0x2ed   : > { %v304_v37 = vadd.f32 %v612_v35, %v300_v36 }
 0x2ef   : > { %673 = vtanh.f32 %v304_v37  ;;  %v305_v40 = vmul.f32 0.5, %v304_v37 }
 0x2f1   : > { %675 = vtanh.f32 %v305_v40  ;;  %v508_v40 = vstv %s507_s25 }
 0x2f2   : > { %vm509_vm6 = vcmp.eq.s32.totalorder %v508_v40, 1 }
 0x2f4   : > { %v302_v38 = vpop.f32.mrf.mxu1 }
 0x2f5   : > { %v674_v39 = vpop.eup %673 }
 0x2f6   : > { %316 = vrot.lane.b32.xlu1 %v674_v39, %s700_s27 }
 0x2f7   : > { %v676_v41 = vpop.eup %675 }
 0x2f8   : > { %v307_v42 = vmul.f32 0.5, %v676_v41 }
 0x2fa   : > { %v308_v43 = vadd.f32 0.5, %v307_v42 }
 0x2fc   : > { %v314_v47 = vmul.f32 %v312_v46, %v308_v43 }
 0x368   : > { %v317_v44 = vpop.permute.xlu1 %316 }
 0x369   : > { %v319_v45 = vmul.f32 %v317_v44, %v308_v43 }
 0x36b   : > { %321 = vrot.lane.b32.xlu0 %v319_v45, %s701_s28 }
 0x3dd   : > { %v322_v48 = vpop.permute.xlu0 %321 }
 0x3de   : > { %v324_v49 = vadd.f32 %v322_v48, %v314_v47 }
 0x3e0   : > { %677 = vtanh.f32 %v324_v49  ;;  %v341_v52 = vsel %vm335_vm4, %v324_v49, %v312_v46 }
 0x3e6   : > { %v678_v50 = vpop.eup %677 }
 0x3e7   : > { %327 = vrot.lane.b32.xlu1 %v678_v50, %s700_s27 }
 0x3ef   : > { %348 = vrot.lane.b32.xlu1 %v341_v52, %s702_s29 }
 0x459   : > { %v328_v53 = vpop.permute.xlu1 %327 }
 0x45a   : > { %v330_v54 = vmul.f32 %v328_v53, %v308_v43 }
 0x45c   : > { %v340_v56 = vsel %vm335_vm4, %v330_v54, %v338_v55 }
 0x45d   : > { %343 = vrot.lane.b32.xlu0 %v340_v56, %s701_s28 }
 0x461   : > { %v349_v57 = vpop.permute.xlu1 %348 }
 0x462   : > { %351 = vst.msk [vmem:[#allocation3] sm:$0xf] %vm259_vm3, %v349_v57 }
 0x469   : > { %v355_v58 = vld [vmem:[#allocation3] sm:$0xf] }
 0x46a   : > { %398 = vrot.lane.b32.xlu0 %v355_v58, %s701_s28 }
 0x4cf   : > { %v344_v61 = vpop.permute.xlu0 %343 }
 0x4d0   : > { %346 = vst.msk [vmem:[#allocation2] sm:$0xf] %vm259_vm3, %v344_v61 }
 0x4d1   : > { %622 = vst.msk [vmem:[%s743_s22 + $0x4] sm:$0xf] %vm259_vm3, %v344_v61 }
 0x4d7   : > { %v354_v62 = vld [vmem:[#allocation2] sm:$0xf] }
 0x4d8   : > { %424 = vrot.lane.b32.xlu0 %v354_v62, %s702_s29  ;;  %v358_v63 = vpack.c.bf16 %v354_v62, %v354_v62 }
 0x4da   : > { %632 = vmatmul.msk.bf16.vlgmr.msra.gmra.mxu2 %vm201_vm1, %v358_v63 }
 0x4dc   : > { %v399_v11 = vpop.permute.xlu0 %398 }
 0x54a   : > { %v425_v20 = vpop.permute.xlu0 %424 }
 0x55d   : > { %v387_v1 = vpop.f32.mrf.mxu2 }
 0x55e   : > { %v391_v2 = vadd.f32 %v623_v0, %v387_v1 }
 0x560   : > { %679 = vtanh.f32 %v391_v2  ;;  %v392_v5 = vmul.f32 0.5, %v391_v2 }
 0x562   : > { %681 = vtanh.f32 %v392_v5 }
 0x565   : > { %v389_v3 = vpop.f32.mrf.mxu2 }
 0x566   : > { %v680_v4 = vpop.eup %679 }
 0x567   : > { %403 = vrot.lane.b32.xlu2 %v680_v4, %s700_s27 }
 0x568   : > { %v682_v6 = vpop.eup %681 }
 0x569   : > { %v394_v7 = vmul.f32 0.5, %v682_v6 }
 0x56b   : > { %v395_v8 = vadd.f32 0.5, %v394_v7 }
 0x56d   : > { %v401_v12 = vmul.f32 %v399_v11, %v395_v8 }
 0x5c1   : > { %v404_v9 = vpop.permute.xlu2 %403 }
 0x5c2   : > { %v406_v10 = vmul.f32 %v404_v9, %v395_v8 }
 0x5c4   : > { %408 = vrot.lane.b32.xlu1 %v406_v10, %s701_s28 }
 0x636   : > { %v409_v13 = vpop.permute.xlu1 %408 }
 0x637   : > { %v411_v14 = vadd.f32 %v409_v13, %v401_v12 }
 0x639   : > { %683 = vtanh.f32 %v411_v14  ;;  %v428_v17 = vsel %vm422_vm5, %v411_v14, %v399_v11 }
 0x63f   : > { %v684_v15 = vpop.eup %683 }
 0x640   : > { %414 = vrot.lane.b32.xlu2 %v684_v15, %s700_s27 }
 0x648   : > { %435 = vrot.lane.b32.xlu2 %v428_v17, %s702_s29 }
 0x69a   : > { %v415_v18 = vpop.permute.xlu2 %414 }
 0x69b   : > { %v417_v19 = vmul.f32 %v415_v18, %v395_v8 }
 0x69d   : > { %v427_v21 = vsel %vm422_vm5, %v417_v19, %v425_v20 }
 0x69e   : > { %430 = vrot.lane.b32.xlu1 %v427_v21, %s701_s28 }
 0x6a2   : > { %v436_v22 = vpop.permute.xlu2 %435 }
 0x6a3   : > { %438 = vst.msk [vmem:[#allocation3] sm:$0xf] %vm259_vm3, %v436_v22 }
 0x6aa   : > { %v442_v23 = vld [vmem:[#allocation3] sm:$0xf] }
 0x6ab   : > { %485 = vrot.lane.b32.xlu1 %v442_v23, %s701_s28 }
 0x710   : > { %v431_v26 = vpop.permute.xlu1 %430 }
 0x711   : > { %433 = vst.msk [vmem:[#allocation2] sm:$0xf] %vm259_vm3, %v431_v26 }
 0x712   : > { %633 = vst.msk [vmem:[%s743_s22 + $0x8] sm:$0xf] %vm259_vm3, %v431_v26 }
 0x718   : > { %v441_v27 = vld [vmem:[#allocation2] sm:$0xf] }
 0x719   : > { %511 = vrot.lane.b32.xlu1 %v441_v27, %s702_s29  ;;  %v445_v28 = vpack.c.bf16 %v441_v27, %v441_v27 }
 0x71b   : > { %643 = vmatmul.msk.bf16.vlgmr.msra.gmra.mxu3 %vm201_vm1, %v445_v28 }
 0x71d   : > { %v486_v41 = vpop.permute.xlu1 %485 }
 0x78b   : > { %v512_v51 = vpop.permute.xlu1 %511 }
 0x79e   : > { %v474_v30 = vpop.f32.mrf.mxu3 }
 0x79f   : > { %v478_v31 = vadd.f32 %v634_v29, %v474_v30 }
 0x7a1   : > { %685 = vtanh.f32 %v478_v31  ;;  %v479_v34 = vmul.f32 0.5, %v478_v31 }
 0x7a3   : > { %687 = vtanh.f32 %v479_v34 }
 0x7a6   : > { %v476_v32 = vpop.f32.mrf.mxu3 }
 0x7a7   : > { %v686_v33 = vpop.eup %685 }
 0x7a8   : > { %490 = vrot.lane.b32.xlu0 %v686_v33, %s700_s27 }
 0x7a9   : > { %v688_v35 = vpop.eup %687 }
 0x7aa   : > { %v481_v36 = vmul.f32 0.5, %v688_v35 }
 0x7ac   : > { %v482_v37 = vadd.f32 0.5, %v481_v36 }
 0x7ae   : > { %v488_v42 = vmul.f32 %v486_v41, %v482_v37 }
 0x81a   : > { %v491_v38 = vpop.permute.xlu0 %490 }
 0x81b   : > { %v493_v39 = vmul.f32 %v491_v38, %v482_v37 }
 0x81d   : > { %495 = vrot.lane.b32.xlu2 %v493_v39, %s701_s28 }
 0x877   : > { %v496_v43 = vpop.permute.xlu2 %495 }
 0x878   : > { %v498_v44 = vadd.f32 %v496_v43, %v488_v42 }
 0x87a   : > { %689 = vtanh.f32 %v498_v44  ;;  %v515_v45 = vsel %vm509_vm6, %v498_v44, %v486_v41 }
 0x87b   : > { %522 = vrot.lane.b32.xlu2 %v515_v45, %s702_s29 }
 0x880   : > { %v690_v46 = vpop.eup %689 }
 0x881   : > { %501 = vrot.lane.b32.xlu0 %v690_v46, %s700_s27 }
 0x8d5   : > { %v523_v47 = vpop.permute.xlu2 %522 }
 0x8d6   : > { %525 = vst.msk [vmem:[#allocation3] sm:$0xf] %vm259_vm3, %v523_v47 }
 0x8dd   : > { %v528_v48 = vld [vmem:[#allocation3] sm:$0xf] }
 0x8de   : > { %529 = vst.msk [vmem:[%s835_s3] sm:$0xf] %vm259_vm3, %v528_v48 }
 0x8f3   : > { %v502_v49 = vpop.permute.xlu0 %501 }
 0x8f4   : > { %v504_v50 = vmul.f32 %v502_v49, %v482_v37 }
 0x8f6   : > { %v514_v52 = vsel %vm509_vm6, %v504_v50, %v512_v51 }
 0x8f7   : > { %517 = vrot.lane.b32.xlu0 %v514_v52, %s701_s28 }
 0x969   : > { %v518_v53 = vpop.permute.xlu0 %517 }
 0x96a   : > { %520 = vst.msk [vmem:[#allocation2] sm:$0xf] %vm259_vm3, %v518_v53 }
 0x96b   : > { %644 = vst.msk [vmem:[%s743_s22 + $0xc] sm:$0xf] %vm259_vm3, %v518_v53 }
 0x96c PF: > { %s14_s12 = sadd.s32 1, %s697_s12  }
 0x96d   : > { %p11_p9 = scmp.ge.s32.totalorder %s14_s12, 5  }
 0x96f   :  { %13 = sbr.rel (!%p11_p9) target bundleno = 1 (0x1), region = 76 }

// kernel: encoder_forward.9
= control target key start
LH: loop header
LB: loop body
LE: loop exit
PB: predicated region body
PF: predicated region fallthrough
CT: control target
= control target key end

     0   :  { %s765_s12 = smov 0   ;;  %s889_s0 = inlined_call_operand.vmem [shape: f32[12,4,128], index: 0, kind: input, shape index: {}]   ;;  %s890_s1 = inlined_call_operand.vmem [shape: bf16[32,128], index: 1, kind: input, shape index: {}]   ;;  %s891_s2 = inlined_call_operand.vmem [shape: bf16[12,4,32], index: 2, kind: output, shape index: {0}]   ;;  %s892_s3 = inlined_call_operand.vmem [shape: f32[4,32], index: 3, kind: output, shape index: {1}]  }
   0x1 LB: > { %s634_s13 = sadd.s32 4294967295, %s739_s12   ;;  %p638_p0 = scmp.ge.s32.totalorder %s739_s12, 1  ;;  %s739_s12 = sphi %s765_s12, %s14_s12  }
   0x2   : > { %p136_p1 = scmp.lt.s32.totalorder %s739_s12, 4 }
   0x4   : > { %p137_p2 = pnand %p638_p0, %p136_p1 }
   0x5   : > { %s773_s14 = sshll.u32 (!%p137_p2), %s634_s13, 2  ;;  %p643_p4 = scmp.ne.s32.totalorder (!%p137_p2), %s634_s13, 0 }
   0x6   : > { %140 = sbr.rel (%p137_p2) target bundleno = 2416 (0x970), region = 28  ;;  %p161_p3 = scmp.lt.s32.totalorder (!%p137_p2), %s773_s14, 11 }
   0xb   : > { %s162_s15 = scalar_select %p161_p3, %s773_s14, 11 }
   0xc   : > { %176 = sbr.rel (%p643_p4) target bundleno = 20 (0x14), region = 32 }
   0xd   : > { %s640_s16 = sshll.u32 %s162_s15, 2  ;;  %s642_s17 = sshll.u32 %s162_s15, 1 }
   0xe   : > { %s780_s20 = scalar_lea.vmem %s889_s0, %s640_s16  ;;  %s785_s23 = scalar_lea.vmem %s891_s2, %s642_s17 }
  0x11   : > { %vm177_vm0 = vcmask 257024   ;;  %v741_v0 = vmov 0.0  }
  0x12   : > { %178 = vst.msk [vmem:[#allocation2] sm:$0xf] %vm177_vm0, %v741_v0 }
  0x13   : > { %179 = vst.msk [vmem:[#allocation3] sm:$0xf] %vm177_vm0, %v741_v0 }
  0x14 PF: > { %v690_v1 = vld [vmem:[%s890_s1 + $0x8] sm:$0xff]  ;;  %v689_v2 = vld [vmem:[%s890_s1] sm:$0xff]  ;;  %vm201_vm1 = vcmask 261120   ;;  %s742_s28 = smov 64   ;;  %s743_s29 = smov 32   ;;  %vm259_vm3 = vcmask 257024  }
  0x15   : > { %211 = vmatpush.bf16.msra.mxu0 %v690_v1  ;;  %v183_v5 = vld [vmem:[%s780_s20] sm:$0xf]  ;;  %s744_s30 = smov 96   ;;  %p245_p5 = scmp.lt.s32.totalorder %s773_s14, 10  ;;  %v692_v30 = vld [vmem:[%s890_s1 + $0x8] sm:$0xff]  ;;  %vm269_vm6 = vcmask 1041408  }
  0x16   : > { %309 = vmatpush.bf16.msra.mxu1 %v692_v30  ;;  %v691_v31 = vld [vmem:[%s890_s1] sm:$0xff]  ;;  %s343_s9 = sadd.s32 1, %s773_s14  ;;  %v694_v59 = vld [vmem:[%s890_s1 + $0x8] sm:$0xff]  ;;  %s440_s17 = sadd.s32 2, %s773_s14  ;;  %vm277_vm7 = vcmask 254976  }
  0x17   : > { %s246_s4 = scalar_select %p245_p5, 1, 0  ;;  %v654_v35 = vld [vmem:[%s780_s20 + $0x4] sm:$0xf]  ;;  %406 = vmatpush.bf16.msra.mxu2 %v694_v59  ;;  %v665_v0 = vld [vmem:[%s780_s20 + $0x8] sm:$0xf] }
  0x18   : > { %p344_p6 = scmp.lt.s32.totalorder %s343_s9, 10  ;;  %v693_v60 = vld [vmem:[%s890_s1] sm:$0xff]  ;;  %p441_p7 = scmp.lt.s32.totalorder %s440_s17, 10 }
  0x19   : > { %v181_v3 = vld [vmem:[#allocation2] sm:$0xf]  ;;  %212 = vmatpush.bf16.msra.mxu0 %v689_v2  ;;  %v247_v18 = vstv %s246_s4  ;;  %s537_s25 = sadd.s32 3, %s773_s14 }
  0x1a   : > { %v184_v4 = vpack.c.bf16 %v181_v3, %v181_v3  ;;  %v182_v10 = vld [vmem:[#allocation3] sm:$0xf]  ;;  %250 = vrot.lane.b32.xlu2 %v181_v3, %s744_s30  ;;  %vm248_vm2 = vcmp.eq.s32.totalorder %v247_v18, 1  ;;  %310 = vmatpush.bf16.msra.mxu1 %v691_v31  ;;  %s345_s10 = scalar_select %p344_p6, 1, 0 }
  0x1b   : > { %407 = vmatpush.bf16.msra.mxu2 %v693_v60  ;;  %s442_s18 = scalar_select %p441_p7, 1, 0 }
  0x1c   : > { %653 = vmatmul.msk.bf16.vlgmr.msra.gmra.mxu0 %vm201_vm1, %v184_v4  ;;  %v346_v51 = vstv %s345_s10  ;;  %p538_p8 = scmp.lt.s32.totalorder %s537_s25, 10 }
  0x1d   : > { %vm347_vm4 = vcmp.eq.s32.totalorder %v346_v51, 1 }
  0x1e   : > { %s539_s26 = scalar_select %p538_p8, 1, 0 }
  0x74   : > { %v251_v26 = vpop.permute.xlu2 %250 }
  0x99   : > { %v214_v6 = vpop.f32.mrf.mxu0 }
  0x9a   : > { %v218_v7 = vadd.f32 %v214_v6, %v183_v5 }
  0x9c   : > { %709 = vtanh.f32 %v218_v7  ;;  %v219_v11 = vmul.f32 0.5, %v218_v7 }
  0x9e   : > { %711 = vtanh.f32 %v219_v11 }
  0xa1   : > { %v216_v8 = vpop.f32.mrf.mxu0 }
  0xa2   : > { %v710_v9 = vpop.eup %709 }
  0xa3   : > { %230 = vrot.lane.b32.xlu0 %v710_v9, %s742_s28 }
  0xa4   : > { %v712_v12 = vpop.eup %711 }
  0xa5   : > { %v221_v13 = vmul.f32 0.5, %v712_v12 }
  0xa7   : > { %v222_v14 = vadd.f32 0.5, %v221_v13 }
  0xab   : > { %225 = vrot.lane.b32.xlu0 %v182_v10, %s743_s29 }
 0x115   : > { %v231_v15 = vpop.permute.xlu0 %230 }
 0x116   : > { %v233_v16 = vmul.f32 %v231_v15, %v222_v14 }
 0x118   : > { %235 = vrot.lane.b32.xlu1 %v233_v16, %s743_s29  ;;  %v443_v16 = vstv %s442_s18 }
 0x119   : > { %vm444_vm5 = vcmp.eq.s32.totalorder %v443_v16, 1 }
 0x11d   : > { %v226_v17 = vpop.permute.xlu0 %225 }
 0x11e   : > { %v228_v19 = vmul.f32 %v226_v17, %v222_v14 }
 0x18a   : > { %v236_v20 = vpop.permute.xlu1 %235 }
 0x18b   : > { %v238_v21 = vadd.f32 %v236_v20, %v228_v19 }
 0x18d   : > { %713 = vtanh.f32 %v238_v21  ;;  %v254_v22 = vsel %vm248_vm2, %v238_v21, %v226_v17 }
 0x18e   : > { %262 = vrot.lane.b32.xlu0 %v254_v22, %s744_s30 }
 0x193   : > { %v714_v23 = vpop.eup %713 }
 0x194   : > { %241 = vrot.lane.b32.xlu1 %v714_v23, %s742_s28 }
 0x200   : > { %v263_v24 = vpop.permute.xlu0 %262 }
 0x201   : > { %265 = vst.msk [vmem:[#allocation3] sm:$0xf] %vm259_vm3, %v263_v24  ;;  %v696_v24 = vld [vmem:[%s890_s1 + $0x8] sm:$0xff] }
 0x202   : > { %503 = vmatpush.bf16.msra.mxu3 %v696_v24 }
 0x206   : > { %v242_v25 = vpop.permute.xlu1 %241 }
 0x207   : > { %v244_v27 = vmul.f32 %v242_v25, %v222_v14  ;;  %v695_v25 = vld [vmem:[%s890_s1] sm:$0xff] }
 0x208   : > { %v280_v29 = vld [vmem:[#allocation3] sm:$0xf]  ;;  %504 = vmatpush.bf16.msra.mxu3 %v695_v25 }
 0x209   : > { %v803_v28 = vsel %vm248_vm2, %v244_v27, %v251_v26 }
 0x20a   : > { %256 = vrot.lane.b32.xlu2 %v803_v28, %s743_s29 }
 0x212   : > { %323 = vrot.lane.b32.xlu2 %v280_v29, %s743_s29 }
 0x264   : > { %v257_v32 = vpop.permute.xlu2 %256 }
 0x265   : > { %260 = vst.msk [vmem:[#allocation2] sm:$0xf] %vm259_vm3, %v257_v32 }
 0x26c   : > { %v279_v33 = vld [vmem:[#allocation2] sm:$0xf]  ;;  %v324_v46 = vpop.permute.xlu2 %323 }
 0x26d   : > { %349 = vrot.lane.b32.xlu2 %v279_v33, %s744_s30  ;;  %v283_v34 = vpack.c.bf16 %v279_v33, %v279_v33 }
 0x26f   : > { %663 = vmatmul.msk.bf16.vlgmr.msra.gmra.mxu1 %vm201_vm1, %v283_v34 }
 0x2c7   : > { %v350_v55 = vpop.permute.xlu2 %349 }
 0x2ec   : > { %v312_v36 = vpop.f32.mrf.mxu1 }
 0x2ed   : > { %v316_v37 = vadd.f32 %v654_v35, %v312_v36  ;;  %v676_v36 = vld [vmem:[%s780_s20 + $0xc] sm:$0xf] }
 0x2ef   : > { %715 = vtanh.f32 %v316_v37  ;;  %v317_v40 = vmul.f32 0.5, %v316_v37 }
 0x2f1   : > { %717 = vtanh.f32 %v317_v40 }
 0x2f4   : > { %v314_v38 = vpop.f32.mrf.mxu1 }
 0x2f5   : > { %v716_v39 = vpop.eup %715 }
 0x2f6   : > { %328 = vrot.lane.b32.xlu1 %v716_v39, %s742_s28 }
 0x2f7   : > { %v718_v41 = vpop.eup %717 }
 0x2f8   : > { %v319_v42 = vmul.f32 0.5, %v718_v41 }
 0x2fa   : > { %v320_v43 = vadd.f32 0.5, %v319_v42 }
 0x2fc   : > { %v326_v47 = vmul.f32 %v324_v46, %v320_v43 }
 0x368   : > { %v329_v44 = vpop.permute.xlu1 %328 }
 0x369   : > { %v331_v45 = vmul.f32 %v329_v44, %v320_v43 }
 0x36b   : > { %333 = vrot.lane.b32.xlu0 %v331_v45, %s743_s29 }
 0x3dd   : > { %v334_v48 = vpop.permute.xlu0 %333 }
 0x3de   : > { %v336_v49 = vadd.f32 %v334_v48, %v326_v47  ;;  %v540_v47 = vstv %s539_s26 }
 0x3df   : > { %vm541_vm8 = vcmp.eq.s32.totalorder %v540_v47, 1 }
 0x3e0   : > { %719 = vtanh.f32 %v336_v49  ;;  %v353_v52 = vsel %vm347_vm4, %v336_v49, %v324_v46 }
 0x3e6   : > { %v720_v50 = vpop.eup %719 }
 0x3e7   : > { %339 = vrot.lane.b32.xlu1 %v720_v50, %s742_s28 }
 0x3ef   : > { %360 = vrot.lane.b32.xlu1 %v353_v52, %s744_s30 }
 0x459   : > { %v340_v53 = vpop.permute.xlu1 %339 }
 0x45a   : > { %v342_v54 = vmul.f32 %v340_v53, %v320_v43 }
 0x45c   : > { %v352_v56 = vsel %vm347_vm4, %v342_v54, %v350_v55  ;;  %v266_v55 = vpack.c.bf16 %v803_v28, %v803_v28 }
 0x45d   : > { %355 = vrot.lane.b32.xlu0 %v352_v56, %s743_s29  ;;  %v364_v27 = vpack.c.bf16 %v352_v56, %v352_v56 }
 0x45f   : > { %v366_v31 = vrot.slane %v364_v27, 2 }
 0x461   : > { %v361_v57 = vpop.permute.xlu1 %360  ;;  %v369_v32 = vsel %vm269_vm6, %v364_v27, %v366_v31 }
 0x462   : > { %363 = vst.msk [vmem:[#allocation3] sm:$0xf] %vm259_vm3, %v361_v57  ;;  %v268_v57 = vrot.slane %v266_v55, 2 }
 0x469   : > { %v377_v58 = vld [vmem:[#allocation3] sm:$0xf] }
 0x46a   : > { %420 = vrot.lane.b32.xlu0 %v377_v58, %s743_s29  ;;  %v272_v58 = vsel %vm269_vm6, %v266_v55, %v268_v57 }
 0x4cf   : > { %v356_v61 = vpop.permute.xlu0 %355 }
 0x4d0   : > { %358 = vst.msk [vmem:[#allocation2] sm:$0xf] %vm259_vm3, %v356_v61 }
 0x4d7   : > { %v376_v62 = vld [vmem:[#allocation2] sm:$0xf] }
 0x4d8   : > { %446 = vrot.lane.b32.xlu0 %v376_v62, %s744_s30  ;;  %v380_v63 = vpack.c.bf16 %v376_v62, %v376_v62 }
 0x4da   : > { %674 = vmatmul.msk.bf16.vlgmr.msra.gmra.mxu2 %vm201_vm1, %v380_v63 }
 0x4dc   : > { %v421_v11 = vpop.permute.xlu0 %420 }
 0x54a   : > { %v447_v20 = vpop.permute.xlu0 %446 }
 0x55d   : > { %v409_v1 = vpop.f32.mrf.mxu2 }
 0x55e   : > { %v413_v2 = vadd.f32 %v665_v0, %v409_v1 }
 0x560   : > { %721 = vtanh.f32 %v413_v2  ;;  %v414_v5 = vmul.f32 0.5, %v413_v2 }
 0x562   : > { %723 = vtanh.f32 %v414_v5 }
 0x565   : > { %v411_v3 = vpop.f32.mrf.mxu2 }
 0x566   : > { %v722_v4 = vpop.eup %721 }
 0x567   : > { %425 = vrot.lane.b32.xlu2 %v722_v4, %s742_s28 }
 0x568   : > { %v724_v6 = vpop.eup %723 }
 0x569   : > { %v416_v7 = vmul.f32 0.5, %v724_v6 }
 0x56b   : > { %v417_v8 = vadd.f32 0.5, %v416_v7 }
 0x56d   : > { %v423_v12 = vmul.f32 %v421_v11, %v417_v8 }
 0x5c1   : > { %v426_v9 = vpop.permute.xlu2 %425 }
 0x5c2   : > { %v428_v10 = vmul.f32 %v426_v9, %v417_v8 }
 0x5c4   : > { %430 = vrot.lane.b32.xlu1 %v428_v10, %s743_s29 }
 0x636   : > { %v431_v13 = vpop.permute.xlu1 %430 }
 0x637   : > { %v433_v14 = vadd.f32 %v431_v13, %v423_v12 }
 0x639   : > { %725 = vtanh.f32 %v433_v14  ;;  %v450_v17 = vsel %vm444_vm5, %v433_v14, %v421_v11 }
 0x63f   : > { %v726_v15 = vpop.eup %725 }
 0x640   : > { %436 = vrot.lane.b32.xlu2 %v726_v15, %s742_s28 }
 0x648   : > { %457 = vrot.lane.b32.xlu2 %v450_v17, %s744_s30 }
 0x69a   : > { %v437_v18 = vpop.permute.xlu2 %436 }
 0x69b   : > { %v439_v19 = vmul.f32 %v437_v18, %v417_v8 }
 0x69d   : > { %v449_v21 = vsel %vm444_vm5, %v439_v19, %v447_v20 }
 0x69e   : > { %452 = vrot.lane.b32.xlu1 %v449_v21, %s743_s29  ;;  %v461_v51 = vpack.c.bf16 %v449_v21, %v449_v21 }
 0x6a0   : > { %v463_v53 = vrot.slane %v461_v51, 2 }
 0x6a2   : > { %v458_v22 = vpop.permute.xlu2 %457  ;;  %v466_v56 = vsel %vm269_vm6, %v461_v51, %v463_v53 }
 0x6a3   : > { %460 = vst.msk [vmem:[#allocation3] sm:$0xf] %vm259_vm3, %v458_v22 }
 0x6aa   : > { %v474_v23 = vld [vmem:[#allocation3] sm:$0xf] }
 0x6ab   : > { %517 = vrot.lane.b32.xlu1 %v474_v23, %s743_s29 }
 0x710   : > { %v453_v26 = vpop.permute.xlu1 %452 }
 0x711   : > { %455 = vst.msk [vmem:[#allocation2] sm:$0xf] %vm259_vm3, %v453_v26 }
 0x718   : > { %v473_v29 = vld [vmem:[#allocation2] sm:$0xf] }
 0x719   : > { %543 = vrot.lane.b32.xlu1 %v473_v29, %s744_s30  ;;  %v477_v30 = vpack.c.bf16 %v473_v29, %v473_v29 }
 0x71b   : > { %685 = vmatmul.msk.bf16.vlgmr.msra.gmra.mxu3 %vm201_vm1, %v477_v30 }
 0x71d   : > { %v518_v33 = vpop.permute.xlu1 %517 }
 0x721   : > { %371 = vrot.lane.b32.xlu1 %v369_v32, %s743_s29 }
 0x78b   : > { %v544_v34 = vpop.permute.xlu1 %543 }
 0x793   : > { %v372_v35 = vpop.permute.xlu1 %371 }
 0x794   : > { %664 = vst.msk [vmem:[%s785_s23 + $0x2] sm:$0x3] %vm277_vm7, %v372_v35 }
 0x79e   : > { %v506_v37 = vpop.f32.mrf.mxu3 }
 0x79f   : > { %v510_v38 = vadd.f32 %v676_v36, %v506_v37 }
 0x7a1   : > { %727 = vtanh.f32 %v510_v38  ;;  %v511_v41 = vmul.f32 0.5, %v510_v38 }
 0x7a3   : > { %729 = vtanh.f32 %v511_v41 }
 0x7a6   : > { %v508_v39 = vpop.f32.mrf.mxu3 }
 0x7a7   : > { %v728_v40 = vpop.eup %727 }
 0x7a8   : > { %522 = vrot.lane.b32.xlu0 %v728_v40, %s742_s28 }
 0x7a9   : > { %v730_v42 = vpop.eup %729 }
 0x7aa   : > { %v513_v43 = vmul.f32 0.5, %v730_v42 }
 0x7ac   : > { %v514_v44 = vadd.f32 0.5, %v513_v43 }
 0x7ae   : > { %v520_v48 = vmul.f32 %v518_v33, %v514_v44 }
 0x81a   : > { %v523_v45 = vpop.permute.xlu0 %522 }
 0x81b   : > { %v525_v46 = vmul.f32 %v523_v45, %v514_v44 }
 0x81d   : > { %527 = vrot.lane.b32.xlu2 %v525_v46, %s743_s29 }
 0x877   : > { %v528_v49 = vpop.permute.xlu2 %527 }
 0x878   : > { %v530_v50 = vadd.f32 %v528_v49, %v520_v48 }
 0x87a   : > { %731 = vtanh.f32 %v530_v50  ;;  %v547_v52 = vsel %vm541_vm8, %v530_v50, %v518_v33 }
 0x87b   : > { %554 = vrot.lane.b32.xlu2 %v547_v52, %s744_s30 }
 0x880   : > { %v732_v54 = vpop.eup %731 }
 0x881   : > { %533 = vrot.lane.b32.xlu0 %v732_v54, %s742_s28 }
 0x883   : > { %468 = vrot.lane.b32.xlu2 %v466_v56, %s743_s29 }
 0x889   : > { %274 = vrot.lane.b32.xlu0 %v272_v58, %s743_s29 }
 0x8d5   : > { %v555_v59 = vpop.permute.xlu2 %554 }
 0x8d6   : > { %557 = vst.msk [vmem:[#allocation3] sm:$0xf] %vm259_vm3, %v555_v59 }
 0x8dd   : > { %v570_v60 = vld [vmem:[#allocation3] sm:$0xf]  ;;  %v469_v61 = vpop.permute.xlu2 %468 }
 0x8de   : > { %571 = vst.msk [vmem:[%s892_s3] sm:$0xf] %vm259_vm3, %v570_v60 }
 0x8df   : > { %675 = vst.msk [vmem:[%s785_s23 + $0x4] sm:$0x3] %vm277_vm7, %v469_v61 }
 0x8f3   : > { %v534_v28 = vpop.permute.xlu0 %533 }
 0x8f4   : > { %v536_v62 = vmul.f32 %v534_v28, %v514_v44 }
 0x8f6   : > { %v546_v63 = vsel %vm541_vm8, %v536_v62, %v544_v34 }
 0x8f7   : > { %v558_v0 = vpack.c.bf16 %v546_v63, %v546_v63  ;;  %549 = vrot.lane.b32.xlu0 %v546_v63, %s743_s29 }
 0x8f9   : > { %v560_v1 = vrot.slane %v558_v0, 2 }
 0x8fb   : > { %v275_v2 = vpop.permute.xlu0 %274  ;;  %v563_v3 = vsel %vm269_vm6, %v558_v0, %v560_v1 }
 0x8fc   : > { %278 = vst.msk [vmem:[%s785_s23] sm:$0x3] %vm277_vm7, %v275_v2  ;;  %565 = vrot.lane.b32.xlu1 %v563_v3, %s743_s29 }
 0x969   : > { %v550_v4 = vpop.permute.xlu0 %549 }
 0x96a   : > { %552 = vst.msk [vmem:[#allocation2] sm:$0xf] %vm259_vm3, %v550_v4 }
 0x96e   : > { %v566_v5 = vpop.permute.xlu1 %565 }
 0x96f   : > { %686 = vst.msk [vmem:[%s785_s23 + $0x6] sm:$0x3] %vm277_vm7, %v566_v5 }
 0x970 PF: > { %s14_s12 = sadd.s32 1, %s739_s12  }
 0x971   : > { %p11_p9 = scmp.ge.s32.totalorder %s14_s12, 5  }
 0x973   :  { %13 = sbr.rel (!%p11_p9) target bundleno = 1 (0x1), region = 76 }

</bundles_post_ra>
